<compile_context>
chip_gen: v7x
topology: tpu7x:2x2x1
jax: 0.10.0
libtpu: 0.0.40
codegen_flags: <defaults>
</compile_context>

<pallas_src>
import functools
import math

import jax
import jax.numpy as jnp
from jax import lax
from jax.experimental import pallas as pl
from jax.experimental.pallas import tpu as pltpu


def _attn_kernel(xq_ref, xk_ref, xv_ref, w_ref, b_ref, o_ref, ctx_ref, *,
                 num_heads, head_dim, causal, batch_per_step, tgt_len, src_len):
    bias = b_ref[...]                     # (4, D) f32, sublane-dense
    xq = xq_ref[...]                      # (G*T, D)
    xk = xk_ref[...]                      # (G*S, D)
    xv = xv_ref[...]                      # (G*S, D)

    # Fused full-width projections over the whole packed batch slab.
    # The 1/sqrt(head_dim) score scale is pre-folded into w[0]/bias[0].
    q = jnp.dot(xq, w_ref[0], preferred_element_type=jnp.float32) + bias[0:1, :]
    k = jnp.dot(xk, w_ref[1], preferred_element_type=jnp.float32) + bias[1:2, :]
    v = jnp.dot(xv, w_ref[2], preferred_element_type=jnp.float32) + bias[2:3, :]

    if causal:
        row = lax.broadcasted_iota(jnp.int32, (tgt_len, src_len), 0)
        col = lax.broadcasted_iota(jnp.int32, (tgt_len, src_len), 1)
        # Finite sentinel (avoids NaN); identical to -inf for square tril masks
        # where every row has at least one unmasked column.
        neg = jnp.float32(-1e30)

    # Per-(batch-slab, head) attention; G and num_heads are small and static.
    for g in range(batch_per_step):
        q_g = q[g * tgt_len:(g + 1) * tgt_len, :]
        k_g = k[g * src_len:(g + 1) * src_len, :]
        v_g = v[g * src_len:(g + 1) * src_len, :]
        for h in range(num_heads):
            sl = slice(h * head_dim, (h + 1) * head_dim)
            qh = q_g[:, sl]               # (T, hd)
            kh = k_g[:, sl]               # (S, hd)
            vh = v_g[:, sl]               # (S, hd)

            # q @ k^T without an explicit transpose: contract the hd axis.
            s = lax.dot_general(qh, kh, (((1,), (1,)), ((), ())),
                                preferred_element_type=jnp.float32)   # (T, S)
            if causal:
                s = jnp.where(col <= row, s, neg)

            # Numerically-stable softmax; exact reciprocal on the EUP path.
            m = jnp.max(s, axis=-1, keepdims=True)
            p = jnp.exp(s - m)
            denom = jnp.sum(p, axis=-1, keepdims=True)
            attn = p * pl.reciprocal(denom, approx=False)

            ctx_ref[g * tgt_len:(g + 1) * tgt_len, sl] = jnp.dot(
                attn, vh, preferred_element_type=jnp.float32)

    # Single fused output projection + bias; one lane-dense (G*T, D) store.
    o_ref[...] = (jnp.dot(ctx_ref[...], w_ref[3],
                          preferred_element_type=jnp.float32)
                  + bias[3:4, :]).astype(o_ref.dtype)


def _pick_grid_steps(batch, tgt_len, src_len):
    """One grid step per TensorCore: 2 on v7x (megacore), 1 on v5e/v6e."""
    try:
        n_cores = int(getattr(jax.devices()[0], "num_cores", 1) or 1)
    except Exception:  # pragma: no cover - defensive
        n_cores = 1
    steps = max(1, min(n_cores, batch))
    # Keep the batch evenly divisible and the packed row blocks sublane-aligned.
    while steps > 1 and (batch % steps
                         or ((batch // steps) * tgt_len) % 8
                         or ((batch // steps) * src_len) % 8):
        steps -= 1
    return steps


def attention_layer(query, key, value, params, num_heads, mask=False,
                    compute_dtype=jnp.float32, grid_steps=None):
    """Pallas implementation of AttentionLayer.forward for (B, T, D) inputs."""
    B, T, D = query.shape
    S = key.shape[1]
    assert D % num_heads == 0
    hd = D // num_heads
    scale = 1.0 / math.sqrt(hd)

    # Weights in "x @ W + b" layout; fold the 1/sqrt(head_dim) score scale into
    # the Q projection (algebraically identical, zero runtime cost).
    w_stack = jnp.stack([params["wq"] * scale, params["wk"],
                         params["wv"], params["wo"]], axis=0)          # (4, D, D)
    b_stack = jnp.stack([params["bq"] * scale, params["bk"],
                         params["bv"], params["bo"]], axis=0)          # (4, D)
    b_stack = b_stack.astype(jnp.float32)

    # Optional bf16 pipeline dtype (v6e/v7x): halves HBM->VMEM DMA bytes for
    # activations and weights; matmuls still accumulate in f32 and the softmax
    # runs in f32 inside the kernel.
    w_stack = w_stack.astype(compute_dtype)
    q2 = query.reshape(B * T, D).astype(compute_dtype)
    k2 = key.reshape(B * S, D).astype(compute_dtype)
    v2 = value.reshape(B * S, D).astype(compute_dtype)

    steps = grid_steps if grid_steps is not None else _pick_grid_steps(B, T, S)
    assert B % steps == 0
    G = B // steps

    kernel = functools.partial(_attn_kernel, num_heads=num_heads, head_dim=hd,
                               causal=mask, batch_per_step=G,
                               tgt_len=T, src_len=S)

    out2 = pl.pallas_call(
        kernel,
        out_shape=jax.ShapeDtypeStruct((B * T, D), jnp.float32),
        grid_spec=pltpu.PrefetchScalarGridSpec(
            num_scalar_prefetch=0,
            grid=(steps,),
            in_specs=[
                pl.BlockSpec((G * T, D), lambda i: (i, 0)),
                pl.BlockSpec((G * S, D), lambda i: (i, 0)),
                pl.BlockSpec((G * S, D), lambda i: (i, 0)),
                pl.BlockSpec((4, D, D), lambda i: (0, 0, 0)),  # constant block
                pl.BlockSpec((4, D), lambda i: (0, 0)),        # constant block
            ],
            out_specs=pl.BlockSpec((G * T, D), lambda i: (i, 0)),
            scratch_shapes=[pltpu.VMEM((G * T, D), jnp.float32)],
        ),
        compiler_params=pltpu.CompilerParams(
            dimension_semantics=("parallel",)),
    )(q2, k2, v2, w_stack, b_stack)

    return out2.reshape(B, T, D)


def attention_layer_ref(query, key, value, params, num_heads, mask=False):
    """Plain-JAX reference reproducing the PyTorch forward exactly."""
    D = query.shape[-1]
    hd = D // num_heads

    q = query @ params["wq"] + params["bq"]
    k = key @ params["wk"] + params["bk"]
    v = value @ params["wv"] + params["bv"]

    # torch.cat(torch.split(x, head_dim, dim=-1), dim=0)
    q = jnp.concatenate(jnp.split(q, num_heads, axis=-1), axis=0)
    k = jnp.concatenate(jnp.split(k, num_heads, axis=-1), axis=0)
    v = jnp.concatenate(jnp.split(v, num_heads, axis=-1), axis=0)

    scores = q @ jnp.swapaxes(k, -1, -2) / math.sqrt(hd)
    if mask:
        tq, tk = scores.shape[-2], scores.shape[-1]
        tril = jnp.tril(jnp.ones((tq, tk), dtype=bool))
        scores = jnp.where(tril, scores, -jnp.inf)
    attn = jax.nn.softmax(scores, axis=-1)
    out = attn @ v
    # torch.cat(torch.split(out, batch_size, dim=0), dim=-1)
    out = jnp.concatenate(jnp.split(out, num_heads, axis=0), axis=-1)
    return out @ params["wo"] + params["bo"]


def init_params(key, model_dim):
    keys = jax.random.split(key, 8)
    s = 1.0 / math.sqrt(model_dim)
    return {
        "wq": jax.random.uniform(keys[0], (model_dim, model_dim), jnp.float32, -s, s),
        "bq": jax.random.uniform(keys[1], (model_dim,), jnp.float32, -s, s),
        "wk": jax.random.uniform(keys[2], (model_dim, model_dim), jnp.float32, -s, s),
        "bk": jax.random.uniform(keys[3], (model_dim,), jnp.float32, -s, s),
        "wv": jax.random.uniform(keys[4], (model_dim, model_dim), jnp.float32, -s, s),
        "bv": jax.random.uniform(keys[5], (model_dim,), jnp.float32, -s, s),
        "wo": jax.random.uniform(keys[6], (model_dim, model_dim), jnp.float32, -s, s),
        "bo": jax.random.uniform(keys[7], (model_dim,), jnp.float32, -s, s),
    }


if __name__ == "__main__":
    B, T, D = 2, 8, 64
    num_heads = 8

    root = jax.random.PRNGKey(0)
    k_q, k_k, k_v, k_p = jax.random.split(root, 4)
    query = jax.random.normal(k_q, (B, T, D), jnp.float32)
    key_in = jax.random.normal(k_k, (B, T, D), jnp.float32)
    value = jax.random.normal(k_v, (B, T, D), jnp.float32)
    params = init_params(k_p, D)

    ok = True
    for causal in (False, True):
        out = attention_layer(query, key_in, value, params, num_heads, mask=causal)
        out = jax.block_until_ready(out)
        ref = attention_layer_ref(query, key_in, value, params, num_heads, mask=causal)
        assert out.shape == (B, T, D)
        ok &= bool(jnp.allclose(out, ref, atol=2e-3, rtol=2e-3))
    assert ok, "mismatch vs reference"

    print("KERNEL_OK")
</pallas_src>

<mosaic_0001>
module attributes {stable_mosaic.version = 11 : i64} {
  func.func @_attn_kernel(%arg0: i32, %arg1: memref<16x64xf32, #tpu.memory_space<vmem>>, %arg2: memref<16x64xf32, #tpu.memory_space<vmem>>, %arg3: memref<16x64xf32, #tpu.memory_space<vmem>>, %arg4: memref<4x64x64xf32, #tpu.memory_space<vmem>>, %arg5: memref<4x64xf32, #tpu.memory_space<vmem>>, %arg6: memref<16x64xf32, #tpu.memory_space<vmem>>, %arg7: memref<16x64xf32, #tpu.memory_space<vmem>>) attributes {dimension_semantics = [#tpu.dimension_semantics<parallel>], iteration_bounds = array<i64: 1>, scalar_prefetch = 0 : i64, scratch_operands = 1 : i64, tpu.core_type = #tpu.core_type<tc>, window_params = [{transform_indices = @transform_0, window_bounds = array<i64: 16, 64>}, {transform_indices = @transform_1, window_bounds = array<i64: 16, 64>}, {transform_indices = @transform_2, window_bounds = array<i64: 16, 64>}, {pipeline_mode = #tpu.pipeline_mode<synchronous>, transform_indices = @transform_3, window_bounds = array<i64: 4, 64, 64>}, {pipeline_mode = #tpu.pipeline_mode<synchronous>, transform_indices = @transform_4, window_bounds = array<i64: 4, 64>}, {transform_indices = @transform_5, window_bounds = array<i64: 16, 64>}]} {
    %c0 = arith.constant 0 : index
    %c0_0 = arith.constant 0 : index
    %0 = vector.load %arg5[%c0, %c0_0] : memref<4x64xf32, #tpu.memory_space<vmem>>, vector<4x64xf32>
    %c0_1 = arith.constant 0 : index
    %c0_2 = arith.constant 0 : index
    %1 = vector.load %arg1[%c0_1, %c0_2] : memref<16x64xf32, #tpu.memory_space<vmem>>, vector<16x64xf32>
    %c0_3 = arith.constant 0 : index
    %c0_4 = arith.constant 0 : index
    %2 = vector.load %arg2[%c0_3, %c0_4] : memref<16x64xf32, #tpu.memory_space<vmem>>, vector<16x64xf32>
    %c0_5 = arith.constant 0 : index
    %c0_6 = arith.constant 0 : index
    %3 = vector.load %arg3[%c0_5, %c0_6] : memref<16x64xf32, #tpu.memory_space<vmem>>, vector<16x64xf32>
    %c0_7 = arith.constant 0 : index
    %c0_8 = arith.constant 0 : index
    %c0_9 = arith.constant 0 : index
    %4 = vector.load %arg4[%c0_7, %c0_8, %c0_9] : memref<4x64x64xf32, #tpu.memory_space<vmem>>, vector<1x64x64xf32>
    %5 = vector.shape_cast %4 : vector<1x64x64xf32> to vector<64x64xf32>
    %cst = arith.constant dense<0.000000e+00> : vector<16x64xf32>
    %6 = tpu.matmul %1, %5, %cst {dimension_numbers = #tpu.dot_dimension_numbers<[1], [0], [0], [1], [0, 0, 1, 1], [], []>} : vector<16x64xf32>, vector<64x64xf32>, vector<16x64xf32> -> vector<16x64xf32>
    %7 = vector.extract_strided_slice %0 {offsets = [0, 0], sizes = [1, 64], strides = [1, 1]} : vector<4x64xf32> to vector<1x64xf32>
    %8 = vector.broadcast %7 : vector<1x64xf32> to vector<16x64xf32>
    %9 = arith.addf %6, %8 : vector<16x64xf32>
    %c1 = arith.constant 1 : index
    %c0_10 = arith.constant 0 : index
    %c0_11 = arith.constant 0 : index
    %10 = vector.load %arg4[%c1, %c0_10, %c0_11] : memref<4x64x64xf32, #tpu.memory_space<vmem>>, vector<1x64x64xf32>
    %11 = vector.shape_cast %10 : vector<1x64x64xf32> to vector<64x64xf32>
    %cst_12 = arith.constant dense<0.000000e+00> : vector<16x64xf32>
    %12 = tpu.matmul %2, %11, %cst_12 {dimension_numbers = #tpu.dot_dimension_numbers<[1], [0], [0], [1], [0, 0, 1, 1], [], []>} : vector<16x64xf32>, vector<64x64xf32>, vector<16x64xf32> -> vector<16x64xf32>
    %13 = vector.extract_strided_slice %0 {offsets = [1, 0], sizes = [1, 64], strides = [1, 1]} : vector<4x64xf32> to vector<1x64xf32>
    %14 = vector.broadcast %13 : vector<1x64xf32> to vector<16x64xf32>
    %15 = arith.addf %12, %14 : vector<16x64xf32>
    %c2 = arith.constant 2 : index
    %c0_13 = arith.constant 0 : index
    %c0_14 = arith.constant 0 : index
    %16 = vector.load %arg4[%c2, %c0_13, %c0_14] : memref<4x64x64xf32, #tpu.memory_space<vmem>>, vector<1x64x64xf32>
    %17 = vector.shape_cast %16 : vector<1x64x64xf32> to vector<64x64xf32>
    %cst_15 = arith.constant dense<0.000000e+00> : vector<16x64xf32>
    %18 = tpu.matmul %3, %17, %cst_15 {dimension_numbers = #tpu.dot_dimension_numbers<[1], [0], [0], [1], [0, 0, 1, 1], [], []>} : vector<16x64xf32>, vector<64x64xf32>, vector<16x64xf32> -> vector<16x64xf32>
    %19 = vector.extract_strided_slice %0 {offsets = [2, 0], sizes = [1, 64], strides = [1, 1]} : vector<4x64xf32> to vector<1x64xf32>
    %20 = vector.broadcast %19 : vector<1x64xf32> to vector<16x64xf32>
    %21 = arith.addf %18, %20 : vector<16x64xf32>
    %22 = vector.extract_strided_slice %9 {offsets = [0, 0], sizes = [8, 64], strides = [1, 1]} : vector<16x64xf32> to vector<8x64xf32>
    %23 = vector.extract_strided_slice %15 {offsets = [0, 0], sizes = [8, 64], strides = [1, 1]} : vector<16x64xf32> to vector<8x64xf32>
    %24 = vector.extract_strided_slice %21 {offsets = [0, 0], sizes = [8, 64], strides = [1, 1]} : vector<16x64xf32> to vector<8x64xf32>
    %25 = vector.extract_strided_slice %22 {offsets = [0, 0], sizes = [8, 8], strides = [1, 1]} : vector<8x64xf32> to vector<8x8xf32>
    %26 = vector.extract_strided_slice %23 {offsets = [0, 0], sizes = [8, 8], strides = [1, 1]} : vector<8x64xf32> to vector<8x8xf32>
    %27 = vector.extract_strided_slice %24 {offsets = [0, 0], sizes = [8, 8], strides = [1, 1]} : vector<8x64xf32> to vector<8x8xf32>
    %cst_16 = arith.constant dense<0.000000e+00> : vector<8x8xf32>
    %28 = tpu.matmul %25, %26, %cst_16 {dimension_numbers = #tpu.dot_dimension_numbers<[1], [1], [0], [0], [0, 0, 1, 0], [], []>} : vector<8x8xf32>, vector<8x8xf32>, vector<8x8xf32> -> vector<8x8xf32>
    %cst_17 = arith.constant dense<0xFF800000> : vector<8xf32>
    %29 = vector.multi_reduction <maximumf>, %28, %cst_17 [1] : vector<8x8xf32> to vector<8xf32>
    %30 = vector.shape_cast %29 : vector<8xf32> to vector<8x1xf32>
    %31 = vector.broadcast %30 : vector<8x1xf32> to vector<8x8xf32>
    %32 = arith.subf %28, %31 : vector<8x8xf32>
    %33 = math.exp %32 : vector<8x8xf32>
    %cst_18 = arith.constant dense<0.000000e+00> : vector<8xf32>
    %34 = vector.multi_reduction <add>, %33, %cst_18 [1] : vector<8x8xf32> to vector<8xf32>
    %35 = vector.shape_cast %34 : vector<8xf32> to vector<8x1xf32>
    %36 = tpu.reciprocal %35 : vector<8x1xf32> -> vector<8x1xf32>
    %37 = vector.broadcast %36 : vector<8x1xf32> to vector<8x8xf32>
    %38 = arith.mulf %33, %37 : vector<8x8xf32>
    %cst_19 = arith.constant dense<0.000000e+00> : vector<8x8xf32>
    %39 = tpu.matmul %38, %27, %cst_19 {dimension_numbers = #tpu.dot_dimension_numbers<[1], [0], [0], [1], [0, 0, 1, 1], [], []>} : vector<8x8xf32>, vector<8x8xf32>, vector<8x8xf32> -> vector<8x8xf32>
    %c0_20 = arith.constant 0 : index
    %c0_21 = arith.constant 0 : index
    %40 = vector.load %arg7[%c0_20, %c0_21] : memref<16x64xf32, #tpu.memory_space<vmem>>, vector<8x8xf32>
    tpu.vector_store %arg7[%c0_20, %c0_21], %39 {strides = array<i32>} : memref<16x64xf32, #tpu.memory_space<vmem>>, vector<8x8xf32>,
    %41 = vector.extract_strided_slice %22 {offsets = [0, 8], sizes = [8, 8], strides = [1, 1]} : vector<8x64xf32> to vector<8x8xf32>
    %42 = vector.extract_strided_slice %23 {offsets = [0, 8], sizes = [8, 8], strides = [1, 1]} : vector<8x64xf32> to vector<8x8xf32>
    %43 = vector.extract_strided_slice %24 {offsets = [0, 8], sizes = [8, 8], strides = [1, 1]} : vector<8x64xf32> to vector<8x8xf32>
    %cst_22 = arith.constant dense<0.000000e+00> : vector<8x8xf32>
    %44 = tpu.matmul %41, %42, %cst_22 {dimension_numbers = #tpu.dot_dimension_numbers<[1], [1], [0], [0], [0, 0, 1, 0], [], []>} : vector<8x8xf32>, vector<8x8xf32>, vector<8x8xf32> -> vector<8x8xf32>
    %cst_23 = arith.constant dense<0xFF800000> : vector<8xf32>
    %45 = vector.multi_reduction <maximumf>, %44, %cst_23 [1] : vector<8x8xf32> to vector<8xf32>
    %46 = vector.shape_cast %45 : vector<8xf32> to vector<8x1xf32>
    %47 = vector.broadcast %46 : vector<8x1xf32> to vector<8x8xf32>
    %48 = arith.subf %44, %47 : vector<8x8xf32>
    %49 = math.exp %48 : vector<8x8xf32>
    %cst_24 = arith.constant dense<0.000000e+00> : vector<8xf32>
    %50 = vector.multi_reduction <add>, %49, %cst_24 [1] : vector<8x8xf32> to vector<8xf32>
    %51 = vector.shape_cast %50 : vector<8xf32> to vector<8x1xf32>
    %52 = tpu.reciprocal %51 : vector<8x1xf32> -> vector<8x1xf32>
    %53 = vector.broadcast %52 : vector<8x1xf32> to vector<8x8xf32>
    %54 = arith.mulf %49, %53 : vector<8x8xf32>
    %cst_25 = arith.constant dense<0.000000e+00> : vector<8x8xf32>
    %55 = tpu.matmul %54, %43, %cst_25 {dimension_numbers = #tpu.dot_dimension_numbers<[1], [0], [0], [1], [0, 0, 1, 1], [], []>} : vector<8x8xf32>, vector<8x8xf32>, vector<8x8xf32> -> vector<8x8xf32>
    %c0_26 = arith.constant 0 : index
    %c8 = arith.constant 8 : index
    %56 = vector.load %arg7[%c0_26, %c8] : memref<16x64xf32, #tpu.memory_space<vmem>>, vector<8x8xf32>
    tpu.vector_store %arg7[%c0_26, %c8], %55 {strides = array<i32>} : memref<16x64xf32, #tpu.memory_space<vmem>>, vector<8x8xf32>,
    %57 = vector.extract_strided_slice %22 {offsets = [0, 16], sizes = [8, 8], strides = [1, 1]} : vector<8x64xf32> to vector<8x8xf32>
    %58 = vector.extract_strided_slice %23 {offsets = [0, 16], sizes = [8, 8], strides = [1, 1]} : vector<8x64xf32> to vector<8x8xf32>
    %59 = vector.extract_strided_slice %24 {offsets = [0, 16], sizes = [8, 8], strides = [1, 1]} : vector<8x64xf32> to vector<8x8xf32>
    %cst_27 = arith.constant dense<0.000000e+00> : vector<8x8xf32>
    %60 = tpu.matmul %57, %58, %cst_27 {dimension_numbers = #tpu.dot_dimension_numbers<[1], [1], [0], [0], [0, 0, 1, 0], [], []>} : vector<8x8xf32>, vector<8x8xf32>, vector<8x8xf32> -> vector<8x8xf32>
    %cst_28 = arith.constant dense<0xFF800000> : vector<8xf32>
    %61 = vector.multi_reduction <maximumf>, %60, %cst_28 [1] : vector<8x8xf32> to vector<8xf32>
    %62 = vector.shape_cast %61 : vector<8xf32> to vector<8x1xf32>
    %63 = vector.broadcast %62 : vector<8x1xf32> to vector<8x8xf32>
    %64 = arith.subf %60, %63 : vector<8x8xf32>
    %65 = math.exp %64 : vector<8x8xf32>
    %cst_29 = arith.constant dense<0.000000e+00> : vector<8xf32>
    %66 = vector.multi_reduction <add>, %65, %cst_29 [1] : vector<8x8xf32> to vector<8xf32>
    %67 = vector.shape_cast %66 : vector<8xf32> to vector<8x1xf32>
    %68 = tpu.reciprocal %67 : vector<8x1xf32> -> vector<8x1xf32>
    %69 = vector.broadcast %68 : vector<8x1xf32> to vector<8x8xf32>
    %70 = arith.mulf %65, %69 : vector<8x8xf32>
    %cst_30 = arith.constant dense<0.000000e+00> : vector<8x8xf32>
    %71 = tpu.matmul %70, %59, %cst_30 {dimension_numbers = #tpu.dot_dimension_numbers<[1], [0], [0], [1], [0, 0, 1, 1], [], []>} : vector<8x8xf32>, vector<8x8xf32>, vector<8x8xf32> -> vector<8x8xf32>
    %c0_31 = arith.constant 0 : index
    %c16 = arith.constant 16 : index
    %72 = vector.load %arg7[%c0_31, %c16] : memref<16x64xf32, #tpu.memory_space<vmem>>, vector<8x8xf32>
    tpu.vector_store %arg7[%c0_31, %c16], %71 {strides = array<i32>} : memref<16x64xf32, #tpu.memory_space<vmem>>, vector<8x8xf32>,
    %73 = vector.extract_strided_slice %22 {offsets = [0, 24], sizes = [8, 8], strides = [1, 1]} : vector<8x64xf32> to vector<8x8xf32>
    %74 = vector.extract_strided_slice %23 {offsets = [0, 24], sizes = [8, 8], strides = [1, 1]} : vector<8x64xf32> to vector<8x8xf32>
    %75 = vector.extract_strided_slice %24 {offsets = [0, 24], sizes = [8, 8], strides = [1, 1]} : vector<8x64xf32> to vector<8x8xf32>
    %cst_32 = arith.constant dense<0.000000e+00> : vector<8x8xf32>
    %76 = tpu.matmul %73, %74, %cst_32 {dimension_numbers = #tpu.dot_dimension_numbers<[1], [1], [0], [0], [0, 0, 1, 0], [], []>} : vector<8x8xf32>, vector<8x8xf32>, vector<8x8xf32> -> vector<8x8xf32>
    %cst_33 = arith.constant dense<0xFF800000> : vector<8xf32>
    %77 = vector.multi_reduction <maximumf>, %76, %cst_33 [1] : vector<8x8xf32> to vector<8xf32>
    %78 = vector.shape_cast %77 : vector<8xf32> to vector<8x1xf32>
    %79 = vector.broadcast %78 : vector<8x1xf32> to vector<8x8xf32>
    %80 = arith.subf %76, %79 : vector<8x8xf32>
    %81 = math.exp %80 : vector<8x8xf32>
    %cst_34 = arith.constant dense<0.000000e+00> : vector<8xf32>
    %82 = vector.multi_reduction <add>, %81, %cst_34 [1] : vector<8x8xf32> to vector<8xf32>
    %83 = vector.shape_cast %82 : vector<8xf32> to vector<8x1xf32>
    %84 = tpu.reciprocal %83 : vector<8x1xf32> -> vector<8x1xf32>
    %85 = vector.broadcast %84 : vector<8x1xf32> to vector<8x8xf32>
    %86 = arith.mulf %81, %85 : vector<8x8xf32>
    %cst_35 = arith.constant dense<0.000000e+00> : vector<8x8xf32>
    %87 = tpu.matmul %86, %75, %cst_35 {dimension_numbers = #tpu.dot_dimension_numbers<[1], [0], [0], [1], [0, 0, 1, 1], [], []>} : vector<8x8xf32>, vector<8x8xf32>, vector<8x8xf32> -> vector<8x8xf32>
    %c0_36 = arith.constant 0 : index
    %c24 = arith.constant 24 : index
    %88 = vector.load %arg7[%c0_36, %c24] : memref<16x64xf32, #tpu.memory_space<vmem>>, vector<8x8xf32>
    tpu.vector_store %arg7[%c0_36, %c24], %87 {strides = array<i32>} : memref<16x64xf32, #tpu.memory_space<vmem>>, vector<8x8xf32>,
    %89 = vector.extract_strided_slice %22 {offsets = [0, 32], sizes = [8, 8], strides = [1, 1]} : vector<8x64xf32> to vector<8x8xf32>
    %90 = vector.extract_strided_slice %23 {offsets = [0, 32], sizes = [8, 8], strides = [1, 1]} : vector<8x64xf32> to vector<8x8xf32>
    %91 = vector.extract_strided_slice %24 {offsets = [0, 32], sizes = [8, 8], strides = [1, 1]} : vector<8x64xf32> to vector<8x8xf32>
    %cst_37 = arith.constant dense<0.000000e+00> : vector<8x8xf32>
    %92 = tpu.matmul %89, %90, %cst_37 {dimension_numbers = #tpu.dot_dimension_numbers<[1], [1], [0], [0], [0, 0, 1, 0], [], []>} : vector<8x8xf32>, vector<8x8xf32>, vector<8x8xf32> -> vector<8x8xf32>
    %cst_38 = arith.constant dense<0xFF800000> : vector<8xf32>
    %93 = vector.multi_reduction <maximumf>, %92, %cst_38 [1] : vector<8x8xf32> to vector<8xf32>
    %94 = vector.shape_cast %93 : vector<8xf32> to vector<8x1xf32>
    %95 = vector.broadcast %94 : vector<8x1xf32> to vector<8x8xf32>
    %96 = arith.subf %92, %95 : vector<8x8xf32>
    %97 = math.exp %96 : vector<8x8xf32>
    %cst_39 = arith.constant dense<0.000000e+00> : vector<8xf32>
    %98 = vector.multi_reduction <add>, %97, %cst_39 [1] : vector<8x8xf32> to vector<8xf32>
    %99 = vector.shape_cast %98 : vector<8xf32> to vector<8x1xf32>
    %100 = tpu.reciprocal %99 : vector<8x1xf32> -> vector<8x1xf32>
    %101 = vector.broadcast %100 : vector<8x1xf32> to vector<8x8xf32>
    %102 = arith.mulf %97, %101 : vector<8x8xf32>
    %cst_40 = arith.constant dense<0.000000e+00> : vector<8x8xf32>
    %103 = tpu.matmul %102, %91, %cst_40 {dimension_numbers = #tpu.dot_dimension_numbers<[1], [0], [0], [1], [0, 0, 1, 1], [], []>} : vector<8x8xf32>, vector<8x8xf32>, vector<8x8xf32> -> vector<8x8xf32>
    %c0_41 = arith.constant 0 : index
    %c32 = arith.constant 32 : index
    %104 = vector.load %arg7[%c0_41, %c32] : memref<16x64xf32, #tpu.memory_space<vmem>>, vector<8x8xf32>
    tpu.vector_store %arg7[%c0_41, %c32], %103 {strides = array<i32>} : memref<16x64xf32, #tpu.memory_space<vmem>>, vector<8x8xf32>,
    %105 = vector.extract_strided_slice %22 {offsets = [0, 40], sizes = [8, 8], strides = [1, 1]} : vector<8x64xf32> to vector<8x8xf32>
    %106 = vector.extract_strided_slice %23 {offsets = [0, 40], sizes = [8, 8], strides = [1, 1]} : vector<8x64xf32> to vector<8x8xf32>
    %107 = vector.extract_strided_slice %24 {offsets = [0, 40], sizes = [8, 8], strides = [1, 1]} : vector<8x64xf32> to vector<8x8xf32>
    %cst_42 = arith.constant dense<0.000000e+00> : vector<8x8xf32>
    %108 = tpu.matmul %105, %106, %cst_42 {dimension_numbers = #tpu.dot_dimension_numbers<[1], [1], [0], [0], [0, 0, 1, 0], [], []>} : vector<8x8xf32>, vector<8x8xf32>, vector<8x8xf32> -> vector<8x8xf32>
    %cst_43 = arith.constant dense<0xFF800000> : vector<8xf32>
    %109 = vector.multi_reduction <maximumf>, %108, %cst_43 [1] : vector<8x8xf32> to vector<8xf32>
    %110 = vector.shape_cast %109 : vector<8xf32> to vector<8x1xf32>
    %111 = vector.broadcast %110 : vector<8x1xf32> to vector<8x8xf32>
    %112 = arith.subf %108, %111 : vector<8x8xf32>
    %113 = math.exp %112 : vector<8x8xf32>
    %cst_44 = arith.constant dense<0.000000e+00> : vector<8xf32>
    %114 = vector.multi_reduction <add>, %113, %cst_44 [1] : vector<8x8xf32> to vector<8xf32>
    %115 = vector.shape_cast %114 : vector<8xf32> to vector<8x1xf32>
    %116 = tpu.reciprocal %115 : vector<8x1xf32> -> vector<8x1xf32>
    %117 = vector.broadcast %116 : vector<8x1xf32> to vector<8x8xf32>
    %118 = arith.mulf %113, %117 : vector<8x8xf32>
    %cst_45 = arith.constant dense<0.000000e+00> : vector<8x8xf32>
    %119 = tpu.matmul %118, %107, %cst_45 {dimension_numbers = #tpu.dot_dimension_numbers<[1], [0], [0], [1], [0, 0, 1, 1], [], []>} : vector<8x8xf32>, vector<8x8xf32>, vector<8x8xf32> -> vector<8x8xf32>
    %c0_46 = arith.constant 0 : index
    %c40 = arith.constant 40 : index
    %120 = vector.load %arg7[%c0_46, %c40] : memref<16x64xf32, #tpu.memory_space<vmem>>, vector<8x8xf32>
    tpu.vector_store %arg7[%c0_46, %c40], %119 {strides = array<i32>} : memref<16x64xf32, #tpu.memory_space<vmem>>, vector<8x8xf32>,
    %121 = vector.extract_strided_slice %22 {offsets = [0, 48], sizes = [8, 8], strides = [1, 1]} : vector<8x64xf32> to vector<8x8xf32>
    %122 = vector.extract_strided_slice %23 {offsets = [0, 48], sizes = [8, 8], strides = [1, 1]} : vector<8x64xf32> to vector<8x8xf32>
    %123 = vector.extract_strided_slice %24 {offsets = [0, 48], sizes = [8, 8], strides = [1, 1]} : vector<8x64xf32> to vector<8x8xf32>
    %cst_47 = arith.constant dense<0.000000e+00> : vector<8x8xf32>
    %124 = tpu.matmul %121, %122, %cst_47 {dimension_numbers = #tpu.dot_dimension_numbers<[1], [1], [0], [0], [0, 0, 1, 0], [], []>} : vector<8x8xf32>, vector<8x8xf32>, vector<8x8xf32> -> vector<8x8xf32>
    %cst_48 = arith.constant dense<0xFF800000> : vector<8xf32>
    %125 = vector.multi_reduction <maximumf>, %124, %cst_48 [1] : vector<8x8xf32> to vector<8xf32>
    %126 = vector.shape_cast %125 : vector<8xf32> to vector<8x1xf32>
    %127 = vector.broadcast %126 : vector<8x1xf32> to vector<8x8xf32>
    %128 = arith.subf %124, %127 : vector<8x8xf32>
    %129 = math.exp %128 : vector<8x8xf32>
    %cst_49 = arith.constant dense<0.000000e+00> : vector<8xf32>
    %130 = vector.multi_reduction <add>, %129, %cst_49 [1] : vector<8x8xf32> to vector<8xf32>
    %131 = vector.shape_cast %130 : vector<8xf32> to vector<8x1xf32>
    %132 = tpu.reciprocal %131 : vector<8x1xf32> -> vector<8x1xf32>
    %133 = vector.broadcast %132 : vector<8x1xf32> to vector<8x8xf32>
    %134 = arith.mulf %129, %133 : vector<8x8xf32>
    %cst_50 = arith.constant dense<0.000000e+00> : vector<8x8xf32>
    %135 = tpu.matmul %134, %123, %cst_50 {dimension_numbers = #tpu.dot_dimension_numbers<[1], [0], [0], [1], [0, 0, 1, 1], [], []>} : vector<8x8xf32>, vector<8x8xf32>, vector<8x8xf32> -> vector<8x8xf32>
    %c0_51 = arith.constant 0 : index
    %c48 = arith.constant 48 : index
    %136 = vector.load %arg7[%c0_51, %c48] : memref<16x64xf32, #tpu.memory_space<vmem>>, vector<8x8xf32>
    tpu.vector_store %arg7[%c0_51, %c48], %135 {strides = array<i32>} : memref<16x64xf32, #tpu.memory_space<vmem>>, vector<8x8xf32>,
    %137 = vector.extract_strided_slice %22 {offsets = [0, 56], sizes = [8, 8], strides = [1, 1]} : vector<8x64xf32> to vector<8x8xf32>
    %138 = vector.extract_strided_slice %23 {offsets = [0, 56], sizes = [8, 8], strides = [1, 1]} : vector<8x64xf32> to vector<8x8xf32>
    %139 = vector.extract_strided_slice %24 {offsets = [0, 56], sizes = [8, 8], strides = [1, 1]} : vector<8x64xf32> to vector<8x8xf32>
    %cst_52 = arith.constant dense<0.000000e+00> : vector<8x8xf32>
    %140 = tpu.matmul %137, %138, %cst_52 {dimension_numbers = #tpu.dot_dimension_numbers<[1], [1], [0], [0], [0, 0, 1, 0], [], []>} : vector<8x8xf32>, vector<8x8xf32>, vector<8x8xf32> -> vector<8x8xf32>
    %cst_53 = arith.constant dense<0xFF800000> : vector<8xf32>
    %141 = vector.multi_reduction <maximumf>, %140, %cst_53 [1] : vector<8x8xf32> to vector<8xf32>
    %142 = vector.shape_cast %141 : vector<8xf32> to vector<8x1xf32>
    %143 = vector.broadcast %142 : vector<8x1xf32> to vector<8x8xf32>
    %144 = arith.subf %140, %143 : vector<8x8xf32>
    %145 = math.exp %144 : vector<8x8xf32>
    %cst_54 = arith.constant dense<0.000000e+00> : vector<8xf32>
    %146 = vector.multi_reduction <add>, %145, %cst_54 [1] : vector<8x8xf32> to vector<8xf32>
    %147 = vector.shape_cast %146 : vector<8xf32> to vector<8x1xf32>
    %148 = tpu.reciprocal %147 : vector<8x1xf32> -> vector<8x1xf32>
    %149 = vector.broadcast %148 : vector<8x1xf32> to vector<8x8xf32>
    %150 = arith.mulf %145, %149 : vector<8x8xf32>
    %cst_55 = arith.constant dense<0.000000e+00> : vector<8x8xf32>
    %151 = tpu.matmul %150, %139, %cst_55 {dimension_numbers = #tpu.dot_dimension_numbers<[1], [0], [0], [1], [0, 0, 1, 1], [], []>} : vector<8x8xf32>, vector<8x8xf32>, vector<8x8xf32> -> vector<8x8xf32>
    %c0_56 = arith.constant 0 : index
    %c56 = arith.constant 56 : index
    %152 = vector.load %arg7[%c0_56, %c56] : memref<16x64xf32, #tpu.memory_space<vmem>>, vector<8x8xf32>
    tpu.vector_store %arg7[%c0_56, %c56], %151 {strides = array<i32>} : memref<16x64xf32, #tpu.memory_space<vmem>>, vector<8x8xf32>,
    %153 = vector.extract_strided_slice %9 {offsets = [8, 0], sizes = [8, 64], strides = [1, 1]} : vector<16x64xf32> to vector<8x64xf32>
    %154 = vector.extract_strided_slice %15 {offsets = [8, 0], sizes = [8, 64], strides = [1, 1]} : vector<16x64xf32> to vector<8x64xf32>
    %155 = vector.extract_strided_slice %21 {offsets = [8, 0], sizes = [8, 64], strides = [1, 1]} : vector<16x64xf32> to vector<8x64xf32>
    %156 = vector.extract_strided_slice %153 {offsets = [0, 0], sizes = [8, 8], strides = [1, 1]} : vector<8x64xf32> to vector<8x8xf32>
    %157 = vector.extract_strided_slice %154 {offsets = [0, 0], sizes = [8, 8], strides = [1, 1]} : vector<8x64xf32> to vector<8x8xf32>
    %158 = vector.extract_strided_slice %155 {offsets = [0, 0], sizes = [8, 8], strides = [1, 1]} : vector<8x64xf32> to vector<8x8xf32>
    %cst_57 = arith.constant dense<0.000000e+00> : vector<8x8xf32>
    %159 = tpu.matmul %156, %157, %cst_57 {dimension_numbers = #tpu.dot_dimension_numbers<[1], [1], [0], [0], [0, 0, 1, 0], [], []>} : vector<8x8xf32>, vector<8x8xf32>, vector<8x8xf32> -> vector<8x8xf32>
    %cst_58 = arith.constant dense<0xFF800000> : vector<8xf32>
    %160 = vector.multi_reduction <maximumf>, %159, %cst_58 [1] : vector<8x8xf32> to vector<8xf32>
    %161 = vector.shape_cast %160 : vector<8xf32> to vector<8x1xf32>
    %162 = vector.broadcast %161 : vector<8x1xf32> to vector<8x8xf32>
    %163 = arith.subf %159, %162 : vector<8x8xf32>
    %164 = math.exp %163 : vector<8x8xf32>
    %cst_59 = arith.constant dense<0.000000e+00> : vector<8xf32>
    %165 = vector.multi_reduction <add>, %164, %cst_59 [1] : vector<8x8xf32> to vector<8xf32>
    %166 = vector.shape_cast %165 : vector<8xf32> to vector<8x1xf32>
    %167 = tpu.reciprocal %166 : vector<8x1xf32> -> vector<8x1xf32>
    %168 = vector.broadcast %167 : vector<8x1xf32> to vector<8x8xf32>
    %169 = arith.mulf %164, %168 : vector<8x8xf32>
    %cst_60 = arith.constant dense<0.000000e+00> : vector<8x8xf32>
    %170 = tpu.matmul %169, %158, %cst_60 {dimension_numbers = #tpu.dot_dimension_numbers<[1], [0], [0], [1], [0, 0, 1, 1], [], []>} : vector<8x8xf32>, vector<8x8xf32>, vector<8x8xf32> -> vector<8x8xf32>
    %c8_61 = arith.constant 8 : index
    %c0_62 = arith.constant 0 : index
    %171 = vector.load %arg7[%c8_61, %c0_62] : memref<16x64xf32, #tpu.memory_space<vmem>>, vector<8x8xf32>
    tpu.vector_store %arg7[%c8_61, %c0_62], %170 {strides = array<i32>} : memref<16x64xf32, #tpu.memory_space<vmem>>, vector<8x8xf32>,
    %172 = vector.extract_strided_slice %153 {offsets = [0, 8], sizes = [8, 8], strides = [1, 1]} : vector<8x64xf32> to vector<8x8xf32>
    %173 = vector.extract_strided_slice %154 {offsets = [0, 8], sizes = [8, 8], strides = [1, 1]} : vector<8x64xf32> to vector<8x8xf32>
    %174 = vector.extract_strided_slice %155 {offsets = [0, 8], sizes = [8, 8], strides = [1, 1]} : vector<8x64xf32> to vector<8x8xf32>
    %cst_63 = arith.constant dense<0.000000e+00> : vector<8x8xf32>
    %175 = tpu.matmul %172, %173, %cst_63 {dimension_numbers = #tpu.dot_dimension_numbers<[1], [1], [0], [0], [0, 0, 1, 0], [], []>} : vector<8x8xf32>, vector<8x8xf32>, vector<8x8xf32> -> vector<8x8xf32>
    %cst_64 = arith.constant dense<0xFF800000> : vector<8xf32>
    %176 = vector.multi_reduction <maximumf>, %175, %cst_64 [1] : vector<8x8xf32> to vector<8xf32>
    %177 = vector.shape_cast %176 : vector<8xf32> to vector<8x1xf32>
    %178 = vector.broadcast %177 : vector<8x1xf32> to vector<8x8xf32>
    %179 = arith.subf %175, %178 : vector<8x8xf32>
    %180 = math.exp %179 : vector<8x8xf32>
    %cst_65 = arith.constant dense<0.000000e+00> : vector<8xf32>
    %181 = vector.multi_reduction <add>, %180, %cst_65 [1] : vector<8x8xf32> to vector<8xf32>
    %182 = vector.shape_cast %181 : vector<8xf32> to vector<8x1xf32>
    %183 = tpu.reciprocal %182 : vector<8x1xf32> -> vector<8x1xf32>
    %184 = vector.broadcast %183 : vector<8x1xf32> to vector<8x8xf32>
    %185 = arith.mulf %180, %184 : vector<8x8xf32>
    %cst_66 = arith.constant dense<0.000000e+00> : vector<8x8xf32>
    %186 = tpu.matmul %185, %174, %cst_66 {dimension_numbers = #tpu.dot_dimension_numbers<[1], [0], [0], [1], [0, 0, 1, 1], [], []>} : vector<8x8xf32>, vector<8x8xf32>, vector<8x8xf32> -> vector<8x8xf32>
    %c8_67 = arith.constant 8 : index
    %c8_68 = arith.constant 8 : index
    %187 = vector.load %arg7[%c8_67, %c8_68] : memref<16x64xf32, #tpu.memory_space<vmem>>, vector<8x8xf32>
    tpu.vector_store %arg7[%c8_67, %c8_68], %186 {strides = array<i32>} : memref<16x64xf32, #tpu.memory_space<vmem>>, vector<8x8xf32>,
    %188 = vector.extract_strided_slice %153 {offsets = [0, 16], sizes = [8, 8], strides = [1, 1]} : vector<8x64xf32> to vector<8x8xf32>
    %189 = vector.extract_strided_slice %154 {offsets = [0, 16], sizes = [8, 8], strides = [1, 1]} : vector<8x64xf32> to vector<8x8xf32>
    %190 = vector.extract_strided_slice %155 {offsets = [0, 16], sizes = [8, 8], strides = [1, 1]} : vector<8x64xf32> to vector<8x8xf32>
    %cst_69 = arith.constant dense<0.000000e+00> : vector<8x8xf32>
    %191 = tpu.matmul %188, %189, %cst_69 {dimension_numbers = #tpu.dot_dimension_numbers<[1], [1], [0], [0], [0, 0, 1, 0], [], []>} : vector<8x8xf32>, vector<8x8xf32>, vector<8x8xf32> -> vector<8x8xf32>
    %cst_70 = arith.constant dense<0xFF800000> : vector<8xf32>
    %192 = vector.multi_reduction <maximumf>, %191, %cst_70 [1] : vector<8x8xf32> to vector<8xf32>
    %193 = vector.shape_cast %192 : vector<8xf32> to vector<8x1xf32>
    %194 = vector.broadcast %193 : vector<8x1xf32> to vector<8x8xf32>
    %195 = arith.subf %191, %194 : vector<8x8xf32>
    %196 = math.exp %195 : vector<8x8xf32>
    %cst_71 = arith.constant dense<0.000000e+00> : vector<8xf32>
    %197 = vector.multi_reduction <add>, %196, %cst_71 [1] : vector<8x8xf32> to vector<8xf32>
    %198 = vector.shape_cast %197 : vector<8xf32> to vector<8x1xf32>
    %199 = tpu.reciprocal %198 : vector<8x1xf32> -> vector<8x1xf32>
    %200 = vector.broadcast %199 : vector<8x1xf32> to vector<8x8xf32>
    %201 = arith.mulf %196, %200 : vector<8x8xf32>
    %cst_72 = arith.constant dense<0.000000e+00> : vector<8x8xf32>
    %202 = tpu.matmul %201, %190, %cst_72 {dimension_numbers = #tpu.dot_dimension_numbers<[1], [0], [0], [1], [0, 0, 1, 1], [], []>} : vector<8x8xf32>, vector<8x8xf32>, vector<8x8xf32> -> vector<8x8xf32>
    %c8_73 = arith.constant 8 : index
    %c16_74 = arith.constant 16 : index
    %203 = vector.load %arg7[%c8_73, %c16_74] : memref<16x64xf32, #tpu.memory_space<vmem>>, vector<8x8xf32>
    tpu.vector_store %arg7[%c8_73, %c16_74], %202 {strides = array<i32>} : memref<16x64xf32, #tpu.memory_space<vmem>>, vector<8x8xf32>,
    %204 = vector.extract_strided_slice %153 {offsets = [0, 24], sizes = [8, 8], strides = [1, 1]} : vector<8x64xf32> to vector<8x8xf32>
    %205 = vector.extract_strided_slice %154 {offsets = [0, 24], sizes = [8, 8], strides = [1, 1]} : vector<8x64xf32> to vector<8x8xf32>
    %206 = vector.extract_strided_slice %155 {offsets = [0, 24], sizes = [8, 8], strides = [1, 1]} : vector<8x64xf32> to vector<8x8xf32>
    %cst_75 = arith.constant dense<0.000000e+00> : vector<8x8xf32>
    %207 = tpu.matmul %204, %205, %cst_75 {dimension_numbers = #tpu.dot_dimension_numbers<[1], [1], [0], [0], [0, 0, 1, 0], [], []>} : vector<8x8xf32>, vector<8x8xf32>, vector<8x8xf32> -> vector<8x8xf32>
    %cst_76 = arith.constant dense<0xFF800000> : vector<8xf32>
    %208 = vector.multi_reduction <maximumf>, %207, %cst_76 [1] : vector<8x8xf32> to vector<8xf32>
    %209 = vector.shape_cast %208 : vector<8xf32> to vector<8x1xf32>
    %210 = vector.broadcast %209 : vector<8x1xf32> to vector<8x8xf32>
    %211 = arith.subf %207, %210 : vector<8x8xf32>
    %212 = math.exp %211 : vector<8x8xf32>
    %cst_77 = arith.constant dense<0.000000e+00> : vector<8xf32>
    %213 = vector.multi_reduction <add>, %212, %cst_77 [1] : vector<8x8xf32> to vector<8xf32>
    %214 = vector.shape_cast %213 : vector<8xf32> to vector<8x1xf32>
    %215 = tpu.reciprocal %214 : vector<8x1xf32> -> vector<8x1xf32>
    %216 = vector.broadcast %215 : vector<8x1xf32> to vector<8x8xf32>
    %217 = arith.mulf %212, %216 : vector<8x8xf32>
    %cst_78 = arith.constant dense<0.000000e+00> : vector<8x8xf32>
    %218 = tpu.matmul %217, %206, %cst_78 {dimension_numbers = #tpu.dot_dimension_numbers<[1], [0], [0], [1], [0, 0, 1, 1], [], []>} : vector<8x8xf32>, vector<8x8xf32>, vector<8x8xf32> -> vector<8x8xf32>
    %c8_79 = arith.constant 8 : index
    %c24_80 = arith.constant 24 : index
    %219 = vector.load %arg7[%c8_79, %c24_80] : memref<16x64xf32, #tpu.memory_space<vmem>>, vector<8x8xf32>
    tpu.vector_store %arg7[%c8_79, %c24_80], %218 {strides = array<i32>} : memref<16x64xf32, #tpu.memory_space<vmem>>, vector<8x8xf32>,
    %220 = vector.extract_strided_slice %153 {offsets = [0, 32], sizes = [8, 8], strides = [1, 1]} : vector<8x64xf32> to vector<8x8xf32>
    %221 = vector.extract_strided_slice %154 {offsets = [0, 32], sizes = [8, 8], strides = [1, 1]} : vector<8x64xf32> to vector<8x8xf32>
    %222 = vector.extract_strided_slice %155 {offsets = [0, 32], sizes = [8, 8], strides = [1, 1]} : vector<8x64xf32> to vector<8x8xf32>
    %cst_81 = arith.constant dense<0.000000e+00> : vector<8x8xf32>
    %223 = tpu.matmul %220, %221, %cst_81 {dimension_numbers = #tpu.dot_dimension_numbers<[1], [1], [0], [0], [0, 0, 1, 0], [], []>} : vector<8x8xf32>, vector<8x8xf32>, vector<8x8xf32> -> vector<8x8xf32>
    %cst_82 = arith.constant dense<0xFF800000> : vector<8xf32>
    %224 = vector.multi_reduction <maximumf>, %223, %cst_82 [1] : vector<8x8xf32> to vector<8xf32>
    %225 = vector.shape_cast %224 : vector<8xf32> to vector<8x1xf32>
    %226 = vector.broadcast %225 : vector<8x1xf32> to vector<8x8xf32>
    %227 = arith.subf %223, %226 : vector<8x8xf32>
    %228 = math.exp %227 : vector<8x8xf32>
    %cst_83 = arith.constant dense<0.000000e+00> : vector<8xf32>
    %229 = vector.multi_reduction <add>, %228, %cst_83 [1] : vector<8x8xf32> to vector<8xf32>
    %230 = vector.shape_cast %229 : vector<8xf32> to vector<8x1xf32>
    %231 = tpu.reciprocal %230 : vector<8x1xf32> -> vector<8x1xf32>
    %232 = vector.broadcast %231 : vector<8x1xf32> to vector<8x8xf32>
    %233 = arith.mulf %228, %232 : vector<8x8xf32>
    %cst_84 = arith.constant dense<0.000000e+00> : vector<8x8xf32>
    %234 = tpu.matmul %233, %222, %cst_84 {dimension_numbers = #tpu.dot_dimension_numbers<[1], [0], [0], [1], [0, 0, 1, 1], [], []>} : vector<8x8xf32>, vector<8x8xf32>, vector<8x8xf32> -> vector<8x8xf32>
    %c8_85 = arith.constant 8 : index
    %c32_86 = arith.constant 32 : index
    %235 = vector.load %arg7[%c8_85, %c32_86] : memref<16x64xf32, #tpu.memory_space<vmem>>, vector<8x8xf32>
    tpu.vector_store %arg7[%c8_85, %c32_86], %234 {strides = array<i32>} : memref<16x64xf32, #tpu.memory_space<vmem>>, vector<8x8xf32>,
    %236 = vector.extract_strided_slice %153 {offsets = [0, 40], sizes = [8, 8], strides = [1, 1]} : vector<8x64xf32> to vector<8x8xf32>
    %237 = vector.extract_strided_slice %154 {offsets = [0, 40], sizes = [8, 8], strides = [1, 1]} : vector<8x64xf32> to vector<8x8xf32>
    %238 = vector.extract_strided_slice %155 {offsets = [0, 40], sizes = [8, 8], strides = [1, 1]} : vector<8x64xf32> to vector<8x8xf32>
    %cst_87 = arith.constant dense<0.000000e+00> : vector<8x8xf32>
    %239 = tpu.matmul %236, %237, %cst_87 {dimension_numbers = #tpu.dot_dimension_numbers<[1], [1], [0], [0], [0, 0, 1, 0], [], []>} : vector<8x8xf32>, vector<8x8xf32>, vector<8x8xf32> -> vector<8x8xf32>
    %cst_88 = arith.constant dense<0xFF800000> : vector<8xf32>
    %240 = vector.multi_reduction <maximumf>, %239, %cst_88 [1] : vector<8x8xf32> to vector<8xf32>
    %241 = vector.shape_cast %240 : vector<8xf32> to vector<8x1xf32>
    %242 = vector.broadcast %241 : vector<8x1xf32> to vector<8x8xf32>
    %243 = arith.subf %239, %242 : vector<8x8xf32>
    %244 = math.exp %243 : vector<8x8xf32>
    %cst_89 = arith.constant dense<0.000000e+00> : vector<8xf32>
    %245 = vector.multi_reduction <add>, %244, %cst_89 [1] : vector<8x8xf32> to vector<8xf32>
    %246 = vector.shape_cast %245 : vector<8xf32> to vector<8x1xf32>
    %247 = tpu.reciprocal %246 : vector<8x1xf32> -> vector<8x1xf32>
    %248 = vector.broadcast %247 : vector<8x1xf32> to vector<8x8xf32>
    %249 = arith.mulf %244, %248 : vector<8x8xf32>
    %cst_90 = arith.constant dense<0.000000e+00> : vector<8x8xf32>
    %250 = tpu.matmul %249, %238, %cst_90 {dimension_numbers = #tpu.dot_dimension_numbers<[1], [0], [0], [1], [0, 0, 1, 1], [], []>} : vector<8x8xf32>, vector<8x8xf32>, vector<8x8xf32> -> vector<8x8xf32>
    %c8_91 = arith.constant 8 : index
    %c40_92 = arith.constant 40 : index
    %251 = vector.load %arg7[%c8_91, %c40_92] : memref<16x64xf32, #tpu.memory_space<vmem>>, vector<8x8xf32>
    tpu.vector_store %arg7[%c8_91, %c40_92], %250 {strides = array<i32>} : memref<16x64xf32, #tpu.memory_space<vmem>>, vector<8x8xf32>,
    %252 = vector.extract_strided_slice %153 {offsets = [0, 48], sizes = [8, 8], strides = [1, 1]} : vector<8x64xf32> to vector<8x8xf32>
    %253 = vector.extract_strided_slice %154 {offsets = [0, 48], sizes = [8, 8], strides = [1, 1]} : vector<8x64xf32> to vector<8x8xf32>
    %254 = vector.extract_strided_slice %155 {offsets = [0, 48], sizes = [8, 8], strides = [1, 1]} : vector<8x64xf32> to vector<8x8xf32>
    %cst_93 = arith.constant dense<0.000000e+00> : vector<8x8xf32>
    %255 = tpu.matmul %252, %253, %cst_93 {dimension_numbers = #tpu.dot_dimension_numbers<[1], [1], [0], [0], [0, 0, 1, 0], [], []>} : vector<8x8xf32>, vector<8x8xf32>, vector<8x8xf32> -> vector<8x8xf32>
    %cst_94 = arith.constant dense<0xFF800000> : vector<8xf32>
    %256 = vector.multi_reduction <maximumf>, %255, %cst_94 [1] : vector<8x8xf32> to vector<8xf32>
    %257 = vector.shape_cast %256 : vector<8xf32> to vector<8x1xf32>
    %258 = vector.broadcast %257 : vector<8x1xf32> to vector<8x8xf32>
    %259 = arith.subf %255, %258 : vector<8x8xf32>
    %260 = math.exp %259 : vector<8x8xf32>
    %cst_95 = arith.constant dense<0.000000e+00> : vector<8xf32>
    %261 = vector.multi_reduction <add>, %260, %cst_95 [1] : vector<8x8xf32> to vector<8xf32>
    %262 = vector.shape_cast %261 : vector<8xf32> to vector<8x1xf32>
    %263 = tpu.reciprocal %262 : vector<8x1xf32> -> vector<8x1xf32>
    %264 = vector.broadcast %263 : vector<8x1xf32> to vector<8x8xf32>
    %265 = arith.mulf %260, %264 : vector<8x8xf32>
    %cst_96 = arith.constant dense<0.000000e+00> : vector<8x8xf32>
    %266 = tpu.matmul %265, %254, %cst_96 {dimension_numbers = #tpu.dot_dimension_numbers<[1], [0], [0], [1], [0, 0, 1, 1], [], []>} : vector<8x8xf32>, vector<8x8xf32>, vector<8x8xf32> -> vector<8x8xf32>
    %c8_97 = arith.constant 8 : index
    %c48_98 = arith.constant 48 : index
    %267 = vector.load %arg7[%c8_97, %c48_98] : memref<16x64xf32, #tpu.memory_space<vmem>>, vector<8x8xf32>
    tpu.vector_store %arg7[%c8_97, %c48_98], %266 {strides = array<i32>} : memref<16x64xf32, #tpu.memory_space<vmem>>, vector<8x8xf32>,
    %268 = vector.extract_strided_slice %153 {offsets = [0, 56], sizes = [8, 8], strides = [1, 1]} : vector<8x64xf32> to vector<8x8xf32>
    %269 = vector.extract_strided_slice %154 {offsets = [0, 56], sizes = [8, 8], strides = [1, 1]} : vector<8x64xf32> to vector<8x8xf32>
    %270 = vector.extract_strided_slice %155 {offsets = [0, 56], sizes = [8, 8], strides = [1, 1]} : vector<8x64xf32> to vector<8x8xf32>
    %cst_99 = arith.constant dense<0.000000e+00> : vector<8x8xf32>
    %271 = tpu.matmul %268, %269, %cst_99 {dimension_numbers = #tpu.dot_dimension_numbers<[1], [1], [0], [0], [0, 0, 1, 0], [], []>} : vector<8x8xf32>, vector<8x8xf32>, vector<8x8xf32> -> vector<8x8xf32>
    %cst_100 = arith.constant dense<0xFF800000> : vector<8xf32>
    %272 = vector.multi_reduction <maximumf>, %271, %cst_100 [1] : vector<8x8xf32> to vector<8xf32>
    %273 = vector.shape_cast %272 : vector<8xf32> to vector<8x1xf32>
    %274 = vector.broadcast %273 : vector<8x1xf32> to vector<8x8xf32>
    %275 = arith.subf %271, %274 : vector<8x8xf32>
    %276 = math.exp %275 : vector<8x8xf32>
    %cst_101 = arith.constant dense<0.000000e+00> : vector<8xf32>
    %277 = vector.multi_reduction <add>, %276, %cst_101 [1] : vector<8x8xf32> to vector<8xf32>
    %278 = vector.shape_cast %277 : vector<8xf32> to vector<8x1xf32>
    %279 = tpu.reciprocal %278 : vector<8x1xf32> -> vector<8x1xf32>
    %280 = vector.broadcast %279 : vector<8x1xf32> to vector<8x8xf32>
    %281 = arith.mulf %276, %280 : vector<8x8xf32>
    %cst_102 = arith.constant dense<0.000000e+00> : vector<8x8xf32>
    %282 = tpu.matmul %281, %270, %cst_102 {dimension_numbers = #tpu.dot_dimension_numbers<[1], [0], [0], [1], [0, 0, 1, 1], [], []>} : vector<8x8xf32>, vector<8x8xf32>, vector<8x8xf32> -> vector<8x8xf32>
    %c8_103 = arith.constant 8 : index
    %c56_104 = arith.constant 56 : index
    %283 = vector.load %arg7[%c8_103, %c56_104] : memref<16x64xf32, #tpu.memory_space<vmem>>, vector<8x8xf32>
    tpu.vector_store %arg7[%c8_103, %c56_104], %282 {strides = array<i32>} : memref<16x64xf32, #tpu.memory_space<vmem>>, vector<8x8xf32>,
    %c0_105 = arith.constant 0 : index
    %c0_106 = arith.constant 0 : index
    %284 = vector.load %arg7[%c0_105, %c0_106] : memref<16x64xf32, #tpu.memory_space<vmem>>, vector<16x64xf32>
    %c3 = arith.constant 3 : index
    %c0_107 = arith.constant 0 : index
    %c0_108 = arith.constant 0 : index
    %285 = vector.load %arg4[%c3, %c0_107, %c0_108] : memref<4x64x64xf32, #tpu.memory_space<vmem>>, vector<1x64x64xf32>
    %286 = vector.shape_cast %285 : vector<1x64x64xf32> to vector<64x64xf32>
    %cst_109 = arith.constant dense<0.000000e+00> : vector<16x64xf32>
    %287 = tpu.matmul %284, %286, %cst_109 {dimension_numbers = #tpu.dot_dimension_numbers<[1], [0], [0], [1], [0, 0, 1, 1], [], []>} : vector<16x64xf32>, vector<64x64xf32>, vector<16x64xf32> -> vector<16x64xf32>
    %288 = vector.extract_strided_slice %0 {offsets = [3, 0], sizes = [1, 64], strides = [1, 1]} : vector<4x64xf32> to vector<1x64xf32>
    %289 = vector.broadcast %288 : vector<1x64xf32> to vector<16x64xf32>
    %290 = arith.addf %287, %289 : vector<16x64xf32>
    %c0_110 = arith.constant 0 : index
    %c0_111 = arith.constant 0 : index
    %291 = vector.load %arg6[%c0_110, %c0_111] : memref<16x64xf32, #tpu.memory_space<vmem>>, vector<16x64xf32>
    tpu.vector_store %arg6[%c0_110, %c0_111], %290 {strides = array<i32>} : memref<16x64xf32, #tpu.memory_space<vmem>>, vector<16x64xf32>,
    return
  }
  func.func @transform_0(%arg0: i32) -> (i32, i32) {
    %c0_i32 = arith.constant 0 : i32
    %c0_i32_0 = arith.constant 0 : i32
    return %arg0, %c0_i32 : i32, i32
  }
  func.func @transform_1(%arg0: i32) -> (i32, i32) {
    %c0_i32 = arith.constant 0 : i32
    %c0_i32_0 = arith.constant 0 : i32
    return %arg0, %c0_i32 : i32, i32
  }
  func.func @transform_2(%arg0: i32) -> (i32, i32) {
    %c0_i32 = arith.constant 0 : i32
    %c0_i32_0 = arith.constant 0 : i32
    return %arg0, %c0_i32 : i32, i32
  }
  func.func @transform_3(%arg0: i32) -> (i32, i32, i32) {
    %c0_i32 = arith.constant 0 : i32
    %c0_i32_0 = arith.constant 0 : i32
    %c0_i32_1 = arith.constant 0 : i32
    %c0_i32_2 = arith.constant 0 : i32
    return %c0_i32, %c0_i32_0, %c0_i32_1 : i32, i32, i32
  }
  func.func @transform_4(%arg0: i32) -> (i32, i32) {
    %c0_i32 = arith.constant 0 : i32
    %c0_i32_0 = arith.constant 0 : i32
    %c0_i32_1 = arith.constant 0 : i32
    return %c0_i32, %c0_i32_0 : i32, i32
  }
  func.func @transform_5(%arg0: i32) -> (i32, i32) {
    %c0_i32 = arith.constant 0 : i32
    %c0_i32_0 = arith.constant 0 : i32
    return %arg0, %c0_i32 : i32, i32
  }
}

</mosaic_0001>

<bundles_post_ra>
// kernel: tpu_custom_call.1
= control target key start
LH: loop header
LB: loop body
LE: loop exit
PB: predicated region body
PF: predicated region fallthrough
CT: control target
= control target key end

     0   :  { %10 = vsyncpa [#allocation4], 0  ;;  %s4411_s0 = inlined_call_operand.hbm [shape: f32[16,64], index: 0, kind: input, shape index: {}]   ;;  %s4412_s1 = inlined_call_operand.hbm [shape: f32[16,64], index: 1, kind: input, shape index: {}]   ;;  %s4413_s2 = inlined_call_operand.hbm [shape: f32[16,64], index: 2, kind: input, shape index: {}]   ;;  %s4414_s3 = inlined_call_operand.hbm [shape: f32[4,64,64], index: 3, kind: input, shape index: {}]   ;;  %s4415_s4 = inlined_call_operand.vmem [shape: f32[4,64], index: 4, kind: input, shape index: {}]   ;;  %s4416_s5 = inlined_call_operand.hbm [shape: f32[16,64], index: 5, kind: output, shape index: {}]  }
   0x1   :  { %11 = vsyncpa [#allocation7], 0 }
   0x2   :  { %12 = vsyncpa [#allocation10], 0 }
   0x3   :  { %13 = vsyncpa [#allocation5], 0  ;;  %s3859_s18 = smov [#allocation6]   ;;  %s3860_s20 = smov [#allocation3]  }
   0x4   :  { %s31_s19 = sshll.u32 %s3859_s18, 4  ;;  %s19_s21 = sshll.u32 %s3860_s20, 4  ;;  %s32_s19 = int_to_ptr.vmem [resolvable:$true] %s31_s19  ;;  %s3911_s21 = int_to_ptr.vmem [resolvable:$true] %s19_s21 }
   0x5   :  { %s3741_s24 = scalar_lea.hbm %s4412_s1, 256 }
   0x6   :  { %p3742_p0 = scmp.ne.s32.totalorder %s4412_s1, %s3741_s24  ;;  %p3745_p1 = scmp.lt.u32.totalorder %s3741_s24, %s4412_s1 }
   0x8   :  { %p3747_p2 = pnand %p3745_p1, %p3742_p0 }
   0xa   :  { %3750 = shalt.err (!%p3747_p2)
}
   0xb   :  { %s3751_s29 = scalar_lea.vmem %s32_s19, 256  ;;  %p3756_p4 = scmp.lt.s32.totalorder %s32_s19, %s32_s19 }
   0xc   :  { %p3752_p3 = scmp.ne.s32.totalorder %s32_s19, %s3751_s29  ;;  %p3757_p5 = scmp.lt.s32.totalorder %s3751_s29, %s3751_s29 }
   0xe   :  { %p3758_p6 = por %p3757_p5, %p3756_p4 }
  0x10   :  { %p3759_p7 = pnand %p3758_p6, %p3752_p3 }
  0x12   :  { %3762 = shalt.err (!%p3759_p7)
}
  0x13   :  { %s3861_s30 = smov 128   ;;  %s3862_s6 = smov 8  }
  0x14   :  { %37 = dma.hbm_to_vmem [thread:$0]  %s4412_s1, 256, %s32_s19, [#allocation7], %s3861_s30, %s3861_s30, %s3862_s6  }
  0x15   :  { %s3763_s11 = scalar_lea.hbm %s4411_s0, 256 }
  0x16   :  { %p3764_p8 = scmp.ne.s32.totalorder %s4411_s0, %s3763_s11  ;;  %p3767_p9 = scmp.lt.u32.totalorder %s3763_s11, %s4411_s0 }
  0x18   :  { %p3769_p10 = pnand %p3767_p9, %p3764_p8 }
  0x1a   :  { %3772 = shalt.err (!%p3769_p10)
}
  0x1b   :  { %s3773_s16 = scalar_lea.vmem %s3911_s21, 256  ;;  %p3778_p12 = scmp.lt.s32.totalorder %s3911_s21, %s3911_s21 }
  0x1c   :  { %p3774_p11 = scmp.ne.s32.totalorder %s3911_s21, %s3773_s16  ;;  %p3779_p13 = scmp.lt.s32.totalorder %s3773_s16, %s3773_s16 }
  0x1e   :  { %p3780_p0 = por %p3779_p13, %p3778_p12 }
  0x20   :  { %p3781_p1 = pnand %p3780_p0, %p3774_p11 }
  0x22   :  { %3784 = shalt.err (!%p3781_p1)
}
  0x23   :  { %25 = dma.hbm_to_vmem [thread:$0]  %s4411_s0, 256, %s3911_s21, [#allocation4], %s3861_s30, %s3861_s30, %s3862_s6  }
  0x24   :  { %s3863_s18 = smov [#allocation8]   ;;  %s3864_s20 = smov [#allocation9]  }
  0x25   :  { %s43_s19 = sshll.u32 %s3863_s18, 4  ;;  %s55_s22 = sshll.u32 %s3864_s20, 4  ;;  %s44_s19 = int_to_ptr.vmem [resolvable:$true] %s43_s19  ;;  %s3948_s22 = int_to_ptr.vmem [resolvable:$true] %s55_s22 }
  0x26   :  { %s3785_s25 = scalar_lea.hbm %s4413_s2, 256 }
  0x27   :  { %p3786_p2 = scmp.ne.s32.totalorder %s4413_s2, %s3785_s25  ;;  %p3789_p3 = scmp.lt.u32.totalorder %s3785_s25, %s4413_s2 }
  0x29   :  { %p3791_p4 = pnand %p3789_p3, %p3786_p2 }
  0x2b   :  { %3794 = shalt.err (!%p3791_p4)
}
  0x2c   :  { %s3795_s0 = scalar_lea.vmem %s44_s19, 256  ;;  %p3800_p6 = scmp.lt.s32.totalorder %s44_s19, %s44_s19 }
  0x2d   :  { %p3796_p5 = scmp.ne.s32.totalorder %s44_s19, %s3795_s0  ;;  %p3801_p7 = scmp.lt.s32.totalorder %s3795_s0, %s3795_s0 }
  0x2f   :  { %p3802_p8 = por %p3801_p7, %p3800_p6 }
  0x31   :  { %p3803_p9 = pnand %p3802_p8, %p3796_p5 }
  0x33   :  { %3806 = shalt.err (!%p3803_p9)
}
  0x34   :  { %49 = dma.hbm_to_vmem [thread:$0]  %s4413_s2, 256, %s44_s19, [#allocation7], %s3861_s30, %s3861_s30, %s3862_s6  }
  0x35   :  { %s3807_s10 = scalar_lea.hbm %s4414_s3, 4096 }
  0x36   :  { %p3808_p10 = scmp.ne.s32.totalorder %s4414_s3, %s3807_s10  ;;  %p3811_p11 = scmp.lt.u32.totalorder %s3807_s10, %s4414_s3 }
  0x38   :  { %p3813_p12 = pnand %p3811_p11, %p3808_p10 }
  0x3a   :  { %3816 = shalt.err (!%p3813_p12)
}
  0x3b   :  { %s3817_s15 = scalar_lea.vmem %s3948_s22, 4096  ;;  %p3822_p0 = scmp.lt.s32.totalorder %s3948_s22, %s3948_s22 }
  0x3c   :  { %p3818_p13 = scmp.ne.s32.totalorder %s3948_s22, %s3817_s15  ;;  %p3823_p1 = scmp.lt.s32.totalorder %s3817_s15, %s3817_s15 }
  0x3e   :  { %p3824_p2 = por %p3823_p1, %p3822_p0 }
  0x40   :  { %p3825_p3 = pnand %p3824_p2, %p3818_p13 }
  0x42   :  { %3828 = shalt.err (!%p3825_p3)
}
  0x43   :  { %61 = dma.hbm_to_vmem [thread:$0]  %s4414_s3, 4096, %s3948_s22, [#allocation10], %s3861_s30, %s3861_s30, %s3862_s6  }
  0x44   :  { %3851 = dma.done.wait [#allocation4], 256  }
  0x45   :  { %3852 = vsyncadd [#allocation4], 4294967040 }
  0x46   :  { %3853 = dma.done.wait [#allocation7], 512  }
  0x47   :  { %3854 = vsyncadd [#allocation7], 4294966784 }
  0x48   :  { %3855 = dma.done.wait [#allocation10], 4096  }
  0x49   :  { %3856 = vsyncadd [#allocation10], 4294963200  ;;  %v178_v0 = vld [vmem:[#allocation9 + $0x40] sm:$0xff]  ;;  %v179_v1 = vld [vmem:[#allocation9 + $0x48] sm:$0xff]  ;;  %vm95_vm0 = vcmask 523264   ;;  %v3865_v28 = vmov 0.0   ;;  %v91_v29 = vlaneseq }
  0x4a   :  { %v83_v2 = vld [vmem:[#allocation9] sm:$0xff]  ;;  %v3606_v3 = vpack.c.bf16 %v179_v1, %v178_v0  ;;  %v84_v4 = vld [vmem:[#allocation9 + $0x8] sm:$0xff]  ;;  %v180_v5 = vld [vmem:[#allocation9 + $0x50] sm:$0xff]  ;;  %vm3866_vm1 = vmmov 0   ;;  %vm365_vm2 = vcmask 64512   ;;  %s3867_s17 = smov 120  }
  0x4b   :  { %v181_v6 = vld [vmem:[#allocation9 + $0x58] sm:$0xff]  ;;  %v3590_v7 = vpack.c.bf16 %v84_v4, %v83_v2  ;;  %v85_v9 = vld [vmem:[#allocation9 + $0x10] sm:$0xff]  ;;  %v182_v11 = vld [vmem:[#allocation9 + $0x60] sm:$0xff]  ;;  %v3992_v30 = vshrl.u32 %v91_v29, 7  ;;  %s3868_s18 = smov 112   ;;  %s3869_s19 = smov 104  }
  0x4c   :  { %v3610_v8 = vpack.c.bf16 %v181_v6, %v180_v5  ;;  %v86_v10 = vld [vmem:[#allocation9 + $0x18] sm:$0xff]  ;;  %3607 = vmatprep.subr.bf16.mxu1 %v3606_v3  ;;  %v183_v13 = vld [vmem:[#allocation9 + $0x68] sm:$0xff]  ;;  %v87_v14 = vld [vmem:[#allocation9 + $0x20] sm:$0xff]  ;;  %s3870_s20 = smov 96   ;;  %s3871_s22 = smov 88   ;;  %vm697_vm3 = vcmask 130112  }
  0x4d   :  { %v3594_v12 = vpack.c.bf16 %v86_v10, %v85_v9  ;;  %v88_v15 = vld [vmem:[#allocation9 + $0x28] sm:$0xff]  ;;  %3609 = vmatpush3.bf16.msra.mxu1 %v3606_v3  ;;  %3591 = vmatprep.subr.bf16.mxu0 %v3590_v7  ;;  %v3614_v16 = vpack.c.bf16 %v183_v13, %v182_v11  ;;  %v79_v17 = vld [vmem:[#allocation6] sm:$0xff]  ;;  %v184_v19 = vld [vmem:[#allocation9 + $0x70] sm:$0xff]  ;;  %v188_v31 = vsub.s32 1, %v3992_v30  ;;  %v93_v33 = vsub.s32 0, %v3992_v30  ;;  %s3872_s23 = smov 72  }
  0x4e   :  { %3593 = vmatpush3.bf16.msra.mxu0 %v3590_v7  ;;  %3611 = vmatprep.subr.bf16.mxu1 %v3610_v8  ;;  %v3598_v18 = vpack.c.bf16 %v88_v15, %v87_v14  ;;  %v185_v20 = vld [vmem:[#allocation9 + $0x78] sm:$0xff]  ;;  %v77_v21 = vld [vmem:[#allocation3] sm:$0xff]  ;;  %v80_v26 = vld [vmem:[#allocation6 + $0x8] sm:$0xff]  ;;  %v282_v2 = vsub.s32 2, %v3992_v30  ;;  %s3873_s24 = smov 80   ;;  %s3874_s25 = smov 16  }
  0x4f   :  { %3595 = vmatprep.subr.bf16.mxu0 %v3594_v12  ;;  %3389 = vmatprep.mubr.msk.f32.mxu1 %vm95_vm0, %v79_v17  ;;  %v89_v22 = vld [vmem:[#allocation9 + $0x30] sm:$0xff]  ;;  %v90_v23 = vld [vmem:[#allocation9 + $0x38] sm:$0xff]  ;;  %v3618_v24 = vpack.c.bf16 %v185_v20, %v184_v19  ;;  %v76_v32 = vld [vmem:[%s4415_s4] sm:$0xf]  ;;  %vm868_vm4 = vcmask 195712   ;;  %s3875_s26 = smov 24  }
  0x50   :  { %3370 = vmatprep.mubr.msk.f32.mxu0 %vm95_vm0, %v77_v21  ;;  %v3602_v25 = vpack.c.bf16 %v90_v23, %v89_v22  ;;  %v78_v27 = vld [vmem:[#allocation3 + $0x8] sm:$0xff]  ;;  %v189_v34 = vrot.slane %v76_v32, %v188_v31  ;;  %v94_v35 = vrot.slane %v76_v32, %v93_v33  ;;  %v272_v44 = vld [vmem:[#allocation9 + $0x80] sm:$0xff]  ;;  %v273_v45 = vld [vmem:[#allocation9 + $0x88] sm:$0xff]  ;;  %v283_v3 = vrot.slane %v76_v32, %v282_v2  ;;  %s3876_s27 = smov 32   ;;  %s3877_s28 = smov 40  }
  0x51   :  { %3613 = vmatpush3.bf16.msra.mxu1 %v3610_v8  ;;  %v274_v46 = vld [vmem:[#allocation9 + $0x90] sm:$0xff]  ;;  %v3622_v47 = vpack.c.bf16 %v273_v45, %v272_v44  ;;  %v275_v48 = vld [vmem:[#allocation9 + $0x98] sm:$0xff]  ;;  %v276_v50 = vld [vmem:[#allocation9 + $0xa0] sm:$0xff]  ;;  %s3878_s29 = smov 48   ;;  %s3879_s0 = smov 56   ;;  %vm1039_vm5 = vcmask 261312  }
  0x52   :  { %3597 = vmatpush3.bf16.msra.mxu0 %v3594_v12  ;;  %3615 = vmatprep.subr.bf16.mxu1 %v3614_v16  ;;  %v3626_v49 = vpack.c.bf16 %v275_v48, %v274_v46  ;;  %v277_v51 = vld [vmem:[#allocation9 + $0xa8] sm:$0xff]  ;;  %v81_v52 = vld [vmem:[#allocation8] sm:$0xff]  ;;  %v279_v55 = vld [vmem:[#allocation9 + $0xb8] sm:$0xff]  ;;  %vm1210_vm6 = vcmask 326912   ;;  %vm1381_vm7 = vcmask 392512   ;;  %vm1552_vm8 = vcmask 458112  }
  0x53   :  { %3599 = vmatprep.subr.bf16.mxu0 %v3598_v18  ;;  %v3630_v53 = vpack.c.bf16 %v277_v51, %v276_v50  ;;  %v278_v54 = vld [vmem:[#allocation9 + $0xb0] sm:$0xff]  ;;  %v82_v57 = vld [vmem:[#allocation8 + $0x8] sm:$0xff]  ;;  %vm1723_vm9 = vcmask 523712   ;;  %s3880_s8 = smov [#allocation11]  }
  0x54   :  { %v3634_v56 = vpack.c.bf16 %v279_v55, %v278_v54  ;;  %s3180_s9 = sshll.u32 %s3880_s8, 4  ;;  %s3181_s9 = int_to_ptr.vmem [resolvable:$true] %s3180_s9 }
  0x55   :  { %3617 = vmatpush3.bf16.msra.mxu1 %v3614_v16  ;;  %s3829_s10 = scalar_lea.vmem %s3181_s9, 256  ;;  %p3834_p5 = scmp.lt.s32.totalorder %s3181_s9, %s3181_s9 }
  0x56   :  { %3601 = vmatpush3.bf16.msra.mxu0 %v3598_v18  ;;  %3619 = vmatprep.subr.bf16.mxu1 %v3618_v24  ;;  %p3830_p4 = scmp.ne.s32.totalorder %s3181_s9, %s3829_s10  ;;  %p3835_p6 = scmp.lt.s32.totalorder %s3829_s10, %s3829_s10 }
  0x57   :  { %3603 = vmatprep.subr.bf16.mxu0 %v3602_v25 }
  0x58   :  { %p3836_p7 = por %p3835_p6, %p3834_p5 }
  0x59   :  { %3621 = vmatpush3.bf16.msra.mxu1 %v3618_v24 }
  0x5a   :  { %3605 = vmatpush3.bf16.msra.mxu0 %v3602_v25  ;;  %3411 = vmatprep.subr.mxu1 %v3865_v28  ;;  %p3837_p8 = pnand %p3836_p7, %p3830_p4 }
  0x5b   :  { %3623 = vmatprep.subr.bf16.mxu0 %v3622_v47 }
  0x5c   :  { %3390 = vmatmul.mubr.msk.f32.vlgmr.msra.gmra.mrb[0].mxu1 %vm95_vm0, %v80_v26 }
  0x5d   :  { %3371 = vmatmul.mubr.msk.f32.vlgmr.msra.gmra.mrb[0].mxu0 %vm95_vm0, %v78_v27  ;;  %3413 = vmatprep.mubr.msk.f32.mxu1 %vm3866_vm1, %v3865_v28 }
  0x5e   :  { %3408 = vmatprep.mubr.msk.f32.mxu0 %vm95_vm0, %v81_v52  ;;  %3625 = vmatpush3.bf16.msra.mxu0 %v3622_v47 }
  0x5f   :  { %3627 = vmatprep.subr.bf16.mxu0 %v3626_v49 }
  0x62   :  { %3629 = vmatpush3.bf16.msra.mxu0 %v3626_v49 }
  0x63   :  { %3631 = vmatprep.subr.bf16.mxu0 %v3630_v53 }
  0x66   :  { %3633 = vmatpush3.bf16.msra.mxu0 %v3630_v53 }
  0x67   :  { %3635 = vmatprep.subr.bf16.mxu0 %v3634_v56 }
  0x6a   :  { %3637 = vmatpush3.bf16.msra.mxu0 %v3634_v56 }
  0x6b   :  { %3451 = vmatprep.subr.mxu0 %v3865_v28 }
  0x6d   :  { %3409 = vmatmul.mubr.msk.f32.vlgmr.msra.gmra.mrb[2].mxu0 %vm95_vm0, %v82_v57 }
  0x6e   :  { %3453 = vmatprep.mubr.msk.f32.mxu0 %vm3866_vm1, %v3865_v28 }
 0x12f   :  { %v3391_v36 = vpop.f32.mrb[0].mxu1 }
 0x130   :  { %v3999_v37 = vadd.f32 %v3391_v36, %v189_v34  ;;  %v262_v38 = vpop.f32.mrb[1].mxu1  ;;  %v3372_v39 = vpop.f32.mrb[0].mxu0 }
 0x131   :  { %v4001_v40 = vadd.f32 %v262_v38, %v189_v34  ;;  %v4003_v41 = vadd.f32 %v3372_v39, %v94_v35  ;;  %v168_v42 = vpop.f32.mrb[1].mxu0 }
 0x132   :  { %v4005_v43 = vadd.f32 %v168_v42, %v94_v35 }
 0x133   :  { %529 = vrot.lane.b32.xlu1 %v4001_v40, %s3867_s17  ;;  %3412 = vmatpush3.xpose.msk.msra.mxu1 %vm365_vm2, %v4001_v40 }
 0x134   :  { %3416 = vmatprep.subr.mxu1 %v3865_v28 }
 0x136   :  { %3414 = vmatmul.mubr.msk.f32.vlgmr.msra.gmra.mrb[2].mxu1 %vm365_vm2, %v4005_v43 }
 0x137   :  { %527 = vrot.lane.b32.xlu1 %v4005_v43, %s3867_s17  ;;  %3418 = vmatprep.mubr.msk.f32.mxu1 %vm3866_vm1, %v3865_v28 }
 0x140   :  { %v3410_v4 = vpop.f32.mrb[2].mxu0 }
 0x141   :  { %v356_v5 = vpop.f32.mrb[3].mxu0  ;;  %v4026_v6 = vadd.f32 %v3410_v4, %v283_v3 }
 0x142   :  { %v4028_v7 = vadd.f32 %v356_v5, %v283_v3 }
 0x144   :  { %3417 = vmatpush3.msra.mxu1 %v4028_v7 }
 0x145   :  { %3421 = vmatprep.subr.mxu1 %v3865_v28 }
 0x1a5   :  { %v530_v10 = vpop.permute.xlu1 %529 }
 0x1a9   :  { %v528_v12 = vpop.permute.xlu1 %527 }
 0x209   :  { %v438_v58 = vpop.f32.mrb[2].mxu1 }
 0x20a   :  { %v3415_v59 = vpop.f32.mrb[3].mxu1  ;;  %v442_v60 = vsel %vm365_vm2, %v438_v58, -inf }
 0x20b   :  { %443 = vmax.xlane.f32.xlu0 %v442_v60 }
 0x298   :  { %v444_v61 = vpop.xlane.xlu0 %443 }
 0x299   :  { %v445_v62 = vsub.f32 %v438_v58, %v444_v61 }
 0x29b   :  { %v446_v63 = vmul.f32 1.442695, %v445_v62 }
 0x29d   :  { %3676 = vpow2.f32 %v446_v63 }
 0x2a7   :  { %v3677_v0 = vpop.eup %3676 }
 0x2a8   :  { %v448_v1 = vsel %vm365_vm2, %v3677_v0, 0.0 }
 0x2a9   :  { %449 = vadd.xlane.f32.xlu0 %v448_v1 }
 0x336   :  { %v450_v8 = vpop.xlane.xlu0 %449 }
 0x337   :  { %3678 = vrcp.f32 %v450_v8 }
 0x341   :  { %v3679_v9 = vpop.eup %3678 }
 0x342   :  { %v452_v11 = vmul.f32 %v3679_v9, %v3677_v0 }
 0x344   :  { %3419 = vmatmul.mubr.msk.f32.vlgmr.msra.gmra.mrb[4].mxu1 %vm365_vm2, %v452_v11 }
 0x345   :  { %3422 = vmatpush3.xpose.msk.msra.mxu1 %vm365_vm2, %v530_v10  ;;  %3423 = vmatprep.mubr.msk.f32.mxu1 %vm3866_vm1, %v3865_v28 }
 0x346   :  { %3426 = vmatprep.subr.mxu1 %v3865_v28 }
 0x348   :  { %3424 = vmatmul.mubr.msk.f32.vlgmr.msra.gmra.mrb[6].mxu1 %vm365_vm2, %v528_v12 }
 0x349   :  { %3428 = vmatprep.mubr.msk.f32.mxu1 %vm3866_vm1, %v3865_v28 }
 0x417   :  { %v522_v13 = vpop.f32.mrb[4].mxu1 }
 0x418   :  { %526 = vst.msk [vmem:[#allocation2] sm:$0xff] %vm365_vm2, %v522_v13  ;;  %v3420_v14 = vpop.f32.mrb[5].mxu1 }
 0x41b   :  { %v601_v15 = vpop.f32.mrb[6].mxu1 }
 0x41c   :  { %v3425_v16 = vpop.f32.mrb[7].mxu1  ;;  %v605_v17 = vsel %vm365_vm2, %v601_v15, -inf }
 0x41d   :  { %606 = vmax.xlane.f32.xlu0 %v605_v17 }
 0x433   :  { %617 = vrot.lane.b32.xlu0 %v4028_v7, %s3867_s17 }
 0x437   :  { %701 = vrot.lane.b32.xlu0 %v4001_v40, %s3868_s18 }
 0x43b   :  { %699 = vrot.lane.b32.xlu0 %v4005_v43, %s3868_s18 }
 0x4aa   :  { %v607_v18 = vpop.xlane.xlu0 %606 }
 0x4ab   :  { %v608_v19 = vsub.f32 %v601_v15, %v607_v18 }
 0x4ad   :  { %v609_v20 = vmul.f32 1.442695, %v608_v19 }
 0x4ae   :  { %v618_v21 = vpop.permute.xlu0 %617 }
 0x4af   :  { %3680 = vpow2.f32 %v609_v20  ;;  %3427 = vmatpush3.msra.mxu1 %v618_v21 }
 0x4b0   :  { %3431 = vmatprep.subr.mxu1 %v3865_v28 }
 0x4b2   :  { %v702_v26 = vpop.permute.xlu0 %701 }
 0x4b6   :  { %v700_v29 = vpop.permute.xlu0 %699 }
 0x4b9   :  { %v3681_v22 = vpop.eup %3680 }
 0x4ba   :  { %v611_v23 = vsel %vm365_vm2, %v3681_v22, 0.0 }
 0x4bb   :  { %612 = vadd.xlane.f32.xlu1 %v611_v23 }
 0x4cc   :  { %788 = vrot.lane.b32.xlu1 %v4028_v7, %s3868_s18 }
 0x4d0   :  { %872 = vrot.lane.b32.xlu1 %v4001_v40, %s3869_s19 }
 0x4d4   :  { %870 = vrot.lane.b32.xlu1 %v4005_v43, %s3869_s19 }
 0x4d8   :  { %1041 = vrot.lane.b32.xlu1 %v4005_v43, %s3870_s20 }
 0x4dc   :  { %1214 = vrot.lane.b32.xlu1 %v4001_v40, %s3871_s22 }
 0x4e0   :  { %1212 = vrot.lane.b32.xlu1 %v4005_v43, %s3871_s22 }
 0x548   :  { %v613_v24 = vpop.xlane.xlu1 %612 }
 0x549   :  { %3682 = vrcp.f32 %v613_v24 }
 0x54c   :  { %v789_v31 = vpop.permute.xlu1 %788 }
 0x550   :  { %v873_v38 = vpop.permute.xlu1 %872 }
 0x553   :  { %v3683_v25 = vpop.eup %3682 }
 0x554   :  { %v615_v27 = vmul.f32 %v3683_v25, %v3681_v22  ;;  %v871_v39 = vpop.permute.xlu1 %870 }
 0x556   :  { %3429 = vmatmul.mubr.msk.f32.vlgmr.msra.gmra.mrb[8].mxu1 %vm365_vm2, %v615_v27 }
 0x557   :  { %3432 = vmatpush3.xpose.msk.msra.mxu1 %vm365_vm2, %v702_v26  ;;  %3433 = vmatprep.mubr.msk.f32.mxu1 %vm3866_vm1, %v3865_v28 }
 0x558   :  { %3436 = vmatprep.subr.mxu1 %v3865_v28  ;;  %v1042_v42 = vpop.permute.xlu1 %1041 }
 0x55a   :  { %3434 = vmatmul.mubr.msk.f32.vlgmr.msra.gmra.mrb[10].mxu1 %vm365_vm2, %v700_v29 }
 0x55b   :  { %3437 = vmatpush3.msra.mxu1 %v789_v31  ;;  %3438 = vmatprep.mubr.msk.f32.mxu1 %vm3866_vm1, %v3865_v28 }
 0x55c   :  { %3441 = vmatprep.subr.mxu1 %v3865_v28  ;;  %v1215_v48 = vpop.permute.xlu1 %1214 }
 0x560   :  { %v1213_v49 = vpop.permute.xlu1 %1212 }
 0x629   :  { %v4071_v32 = vpop.f32.mrb[8].mxu1 }
 0x62a   :  { %v3430_v33 = vpop.f32.mrb[9].mxu1 }
 0x62d   :  { %v773_v34 = vpop.f32.mrb[10].mxu1 }
 0x62e   :  { %v3435_v35 = vpop.f32.mrb[11].mxu1  ;;  %v777_v36 = vsel %vm365_vm2, %v773_v34, -inf }
 0x62f   :  { %778 = vmax.xlane.f32.xlu0 %v777_v36 }
 0x645   :  { %1043 = vrot.lane.b32.xlu0 %v4001_v40, %s3870_s20 }
 0x649   :  { %1554 = vrot.lane.b32.xlu0 %v4005_v43, %s3872_s23 }
 0x64d   :  { %1886 = vrot.lane.b32.xlu0 %v4003_v41, %s3867_s17 }
 0x651   :  { %2057 = vrot.lane.b32.xlu0 %v4003_v41, %s3868_s18 }
 0x655   :  { %2227 = vrot.lane.b32.xlu0 %v4003_v41, %s3869_s19 }
 0x659   :  { %2397 = vrot.lane.b32.xlu0 %v4003_v41, %s3870_s20 }
 0x65d   :  { %2567 = vrot.lane.b32.xlu0 %v4003_v41, %s3871_s22 }
 0x661   :  { %2737 = vrot.lane.b32.xlu0 %v4003_v41, %s3873_s24 }
 0x665   :  { %2907 = vrot.lane.b32.xlu0 %v4003_v41, %s3872_s23 }
 0x6bc   :  { %v779_v44 = vpop.xlane.xlu0 %778 }
 0x6bd   :  { %v780_v45 = vsub.f32 %v773_v34, %v779_v44 }
 0x6bf   :  { %v781_v46 = vmul.f32 1.442695, %v780_v45 }
 0x6c0   :  { %v1044_v47 = vpop.permute.xlu0 %1043 }
 0x6c1   :  { %3684 = vpow2.f32 %v781_v46  ;;  %3452 = vmatpush3.xpose.msk.msra.mxu0 %vm365_vm2, %v1044_v47 }
 0x6c2   :  { %3461 = vmatprep.subr.mxu0 %v3865_v28 }
 0x6c4   :  { %3454 = vmatmul.mubr.msk.f32.vlgmr.msra.gmra.mrb[4].mxu0 %vm365_vm2, %v1042_v42  ;;  %v1555_v52 = vpop.permute.xlu0 %1554 }
 0x6c5   :  { %3462 = vmatpush3.xpose.msk.msra.mxu0 %vm365_vm2, %v1215_v48  ;;  %3463 = vmatprep.mubr.msk.f32.mxu0 %vm3866_vm1, %v3865_v28 }
 0x6c6   :  { %3471 = vmatprep.subr.mxu0 %v3865_v28 }
 0x6c8   :  { %3464 = vmatmul.mubr.msk.f32.vlgmr.msra.gmra.mrb[6].mxu0 %vm365_vm2, %v1213_v49  ;;  %v1887_v55 = vpop.permute.xlu0 %1886 }
 0x6c9   :  { %3473 = vmatprep.mubr.msk.f32.mxu0 %vm3866_vm1, %v3865_v28 }
 0x6cb   :  { %v3685_v50 = vpop.eup %3684 }
 0x6cc   :  { %v783_v51 = vsel %vm365_vm2, %v3685_v50, 0.0  ;;  %v2058_v59 = vpop.permute.xlu0 %2057 }
 0x6cd   :  { %784 = vadd.xlane.f32.xlu1 %v783_v51 }
 0x6de   :  { %1385 = vrot.lane.b32.xlu1 %v4001_v40, %s3873_s24 }
 0x6e2   :  { %1383 = vrot.lane.b32.xlu1 %v4005_v43, %s3873_s24 }
 0x6e6   :  { %1556 = vrot.lane.b32.xlu1 %v4001_v40, %s3872_s23 }
 0x6ea   :  { %1888 = vrot.lane.b32.xlu1 %v3999_v37, %s3867_s17 }
 0x6ee   :  { %2059 = vrot.lane.b32.xlu1 %v3999_v37, %s3868_s18 }
 0x6f2   :  { %2229 = vrot.lane.b32.xlu1 %v3999_v37, %s3869_s19 }
 0x6f6   :  { %2399 = vrot.lane.b32.xlu1 %v3999_v37, %s3870_s20 }
 0x6fa   :  { %2569 = vrot.lane.b32.xlu1 %v3999_v37, %s3871_s22 }
 0x6fe   :  { %2739 = vrot.lane.b32.xlu1 %v3999_v37, %s3873_s24 }
 0x702   :  { %2909 = vrot.lane.b32.xlu1 %v3999_v37, %s3872_s23 }
 0x75a   :  { %v785_v40 = vpop.xlane.xlu1 %784 }
 0x75b   :  { %3686 = vrcp.f32 %v785_v40 }
 0x75e   :  { %v1386_v43 = vpop.permute.xlu1 %1385 }
 0x75f   :  { %3472 = vmatpush3.xpose.msk.msra.mxu0 %vm365_vm2, %v1386_v43 }
 0x760   :  { %3481 = vmatprep.subr.mxu0 %v3865_v28 }
 0x762   :  { %v1384_v53 = vpop.permute.xlu1 %1383 }
 0x763   :  { %3474 = vmatmul.mubr.msk.f32.vlgmr.msra.gmra.mrb[8].mxu0 %vm365_vm2, %v1384_v53 }
 0x764   :  { %3483 = vmatprep.mubr.msk.f32.mxu0 %vm3866_vm1, %v3865_v28 }
 0x765   :  { %v3687_v54 = vpop.eup %3686 }
 0x766   :  { %v787_v56 = vmul.f32 %v3687_v54, %v3685_v50  ;;  %v1557_v57 = vpop.permute.xlu1 %1556 }
 0x767   :  { %3482 = vmatpush3.xpose.msk.msra.mxu0 %vm365_vm2, %v1557_v57 }
 0x768   :  { %3439 = vmatmul.mubr.msk.f32.vlgmr.msra.gmra.mrb[12].mxu1 %vm365_vm2, %v787_v56  ;;  %3491 = vmatprep.subr.mxu0 %v3865_v28 }
 0x769   :  { %3442 = vmatpush3.xpose.msk.msra.mxu1 %vm365_vm2, %v873_v38  ;;  %3443 = vmatprep.mubr.msk.f32.mxu1 %vm3866_vm1, %v3865_v28 }
 0x76a   :  { %v1889_v58 = vpop.permute.xlu1 %1888  ;;  %3484 = vmatmul.mubr.msk.f32.vlgmr.msra.gmra.mrb[10].mxu0 %vm365_vm2, %v1555_v52  ;;  %3446 = vmatprep.subr.mxu1 %v3865_v28 }
 0x76b   :  { %3492 = vmatpush3.xpose.msk.msra.mxu0 %vm365_vm2, %v3999_v37  ;;  %3493 = vmatprep.mubr.msk.f32.mxu0 %vm3866_vm1, %v3865_v28  ;;  %v2228_v37 = vpop.permute.xlu0 %2227 }
 0x76c   :  { %3444 = vmatmul.mubr.msk.f32.vlgmr.msra.gmra.mrb[14].mxu1 %vm365_vm2, %v871_v39  ;;  %3501 = vmatprep.subr.mxu0 %v3865_v28 }
 0x76d   :  { %3448 = vmatprep.mubr.msk.f32.mxu1 %vm3866_vm1, %v3865_v28 }
 0x76e   :  { %v2060_v60 = vpop.permute.xlu1 %2059  ;;  %3494 = vmatmul.mubr.msk.f32.vlgmr.msra.gmra.mrb[12].mxu0 %vm365_vm2, %v4003_v41 }
 0x76f   :  { %3502 = vmatpush3.xpose.msk.msra.mxu0 %vm365_vm2, %v1889_v58  ;;  %3503 = vmatprep.mubr.msk.f32.mxu0 %vm3866_vm1, %v3865_v28  ;;  %v2398_v41 = vpop.permute.xlu0 %2397 }
 0x770   :  { %3511 = vmatprep.subr.mxu0 %v3865_v28 }
 0x772   :  { %v2230_v61 = vpop.permute.xlu1 %2229  ;;  %3504 = vmatmul.mubr.msk.f32.vlgmr.msra.gmra.mrb[14].mxu0 %vm365_vm2, %v1887_v55 }
 0x773   :  { %3512 = vmatpush3.xpose.msk.msra.mxu0 %vm365_vm2, %v2060_v60  ;;  %3513 = vmatprep.mubr.msk.f32.mxu0 %vm3866_vm1, %v3865_v28  ;;  %v2568_v0 = vpop.permute.xlu0 %2567 }
 0x774   :  { %3521 = vmatprep.subr.mxu0 %v3865_v28 }
 0x776   :  { %v2400_v62 = vpop.permute.xlu1 %2399  ;;  %3514 = vmatmul.mubr.msk.f32.vlgmr.msra.gmra.mrb[16].mxu0 %vm365_vm2, %v2058_v59 }
 0x777   :  { %3522 = vmatpush3.xpose.msk.msra.mxu0 %vm365_vm2, %v2230_v61  ;;  %3523 = vmatprep.mubr.msk.f32.mxu0 %vm3866_vm1, %v3865_v28  ;;  %v2738_v2 = vpop.permute.xlu0 %2737 }
 0x778   :  { %3531 = vmatprep.subr.mxu0 %v3865_v28 }
 0x77a   :  { %v2570_v63 = vpop.permute.xlu1 %2569  ;;  %3524 = vmatmul.mubr.msk.f32.vlgmr.msra.gmra.mrb[18].mxu0 %vm365_vm2, %v2228_v37 }
 0x77b   :  { %3532 = vmatpush3.xpose.msk.msra.mxu0 %vm365_vm2, %v2400_v62  ;;  %3533 = vmatprep.mubr.msk.f32.mxu0 %vm3866_vm1, %v3865_v28  ;;  %v2908_v4 = vpop.permute.xlu0 %2907 }
 0x77c   :  { %3541 = vmatprep.subr.mxu0 %v3865_v28 }
 0x77e   :  { %3534 = vmatmul.mubr.msk.f32.vlgmr.msra.gmra.mrb[20].mxu0 %vm365_vm2, %v2398_v41  ;;  %v2740_v1 = vpop.permute.xlu1 %2739 }
 0x77f   :  { %3542 = vmatpush3.xpose.msk.msra.mxu0 %vm365_vm2, %v2570_v63  ;;  %3543 = vmatprep.mubr.msk.f32.mxu0 %vm3866_vm1, %v3865_v28 }
 0x780   :  { %3551 = vmatprep.subr.mxu0 %v3865_v28 }
 0x782   :  { %3544 = vmatmul.mubr.msk.f32.vlgmr.msra.gmra.mrb[22].mxu0 %vm365_vm2, %v2568_v0  ;;  %v2910_v3 = vpop.permute.xlu1 %2909 }
 0x783   :  { %3552 = vmatpush3.xpose.msk.msra.mxu0 %vm365_vm2, %v2740_v1  ;;  %3553 = vmatprep.mubr.msk.f32.mxu0 %vm3866_vm1, %v3865_v28 }
 0x784   :  { %3561 = vmatprep.subr.mxu0 %v3865_v28 }
 0x786   :  { %3554 = vmatmul.mubr.msk.f32.vlgmr.msra.gmra.mrb[24].mxu0 %vm365_vm2, %v2738_v2 }
 0x787   :  { %3562 = vmatpush3.xpose.msk.msra.mxu0 %vm365_vm2, %v2910_v3  ;;  %3563 = vmatprep.mubr.msk.f32.mxu0 %vm3866_vm1, %v3865_v28 }
 0x78a   :  { %3564 = vmatmul.mubr.msk.f32.vlgmr.msra.gmra.mrb[26].mxu0 %vm365_vm2, %v2908_v4 }
 0x797   :  { %v1115_v5 = vpop.f32.mrb[4].mxu0 }
 0x798   :  { %v3455_v8 = vpop.f32.mrb[5].mxu0  ;;  %v1119_v9 = vsel %vm365_vm2, %v1115_v5, -inf }
 0x799   :  { %1120 = vmax.xlane.f32.xlu0 %v1119_v9 }
 0x79b   :  { %v1286_v10 = vpop.f32.mrb[6].mxu0 }
 0x79c   :  { %v3465_v11 = vpop.f32.mrb[7].mxu0  ;;  %v1290_v12 = vsel %vm365_vm2, %v1286_v10, -inf }
 0x79d   :  { %1291 = vmax.xlane.f32.xlu0 %v1290_v12 }
 0x826   :  { %v1121_v22 = vpop.xlane.xlu0 %1120 }
 0x827   :  { %v1122_v39 = vsub.f32 %v1115_v5, %v1121_v22 }
 0x829   :  { %v1123_v47 = vmul.f32 1.442695, %v1122_v39 }
 0x82a   :  { %v1292_v29 = vpop.xlane.xlu0 %1291 }
 0x82b   :  { %v1293_v34 = vsub.f32 %v1286_v10, %v1292_v29 }
 0x82d   :  { %v1294_v42 = vmul.f32 1.442695, %v1293_v34 }
 0x82f   :  { %3688 = vpow2.f32 %v1294_v42 }
 0x830   :  { %3690 = vpow2.f32 %v1123_v47 }
 0x836   :  { %v1457_v13 = vpop.f32.mrb[8].mxu0 }
 0x837   :  { %v3475_v14 = vpop.f32.mrb[9].mxu0  ;;  %v1461_v15 = vsel %vm365_vm2, %v1457_v13, -inf }
 0x838   :  { %1462 = vmax.xlane.f32.xlu1 %v1461_v15 }
 0x839   :  { %v4207_v55 = vpop.eup %3688 }
 0x83a   :  { %v1296_v59 = vsel %vm365_vm2, %v4207_v55, 0.0  ;;  %v4215_v60 = vpop.eup %3690 }
 0x83b   :  { %v4183_v16 = vpop.f32.mrb[12].mxu1  ;;  %v1125_v37 = vsel %vm365_vm2, %v4215_v60, 0.0 }
 0x83c   :  { %v3440_v17 = vpop.f32.mrb[13].mxu1 }
 0x83d   :  { %v1628_v18 = vpop.f32.mrb[10].mxu0 }
 0x83e   :  { %v3485_v19 = vpop.f32.mrb[11].mxu0  ;;  %v1632_v20 = vsel %vm365_vm2, %v1628_v18, -inf }
 0x83f   :  { %1633 = vmax.xlane.f32.xlu0 %v1632_v20  ;;  %v4186_v21 = vpop.f32.mrb[14].mxu1 }
 0x840   :  { %v3445_v23 = vpop.f32.mrb[15].mxu1 }
 0x841   :  { %v1797_v24 = vpop.f32.mrb[12].mxu0 }
 0x842   :  { %v3495_v25 = vpop.f32.mrb[13].mxu0  ;;  %v1801_v26 = vsel %vm365_vm2, %v1797_v24, -inf }
 0x843   :  { %1802 = vmax.xlane.f32.xlu1 %v1801_v26 }
 0x845   :  { %v1960_v27 = vpop.f32.mrb[14].mxu0 }
 0x846   :  { %v3505_v31 = vpop.f32.mrb[15].mxu0  ;;  %v1964_v33 = vsel %vm365_vm2, %v1960_v27, -inf }
 0x847   :  { %1965 = vmax.xlane.f32.xlu0 %v1964_v33 }
 0x849   :  { %v2131_v35 = vpop.f32.mrb[16].mxu0 }
 0x84a   :  { %v3515_v36 = vpop.f32.mrb[17].mxu0  ;;  %v2135_v38 = vsel %vm365_vm2, %v2131_v35, -inf }
 0x84b   :  { %2136 = vmax.xlane.f32.xlu1 %v2135_v38  ;;  %v948_v36 = vsel %vm365_vm2, %v4186_v21, -inf }
 0x84d   :  { %v4191_v44 = vpop.f32.mrb[18].mxu0 }
 0x84e   :  { %v3525_v45 = vpop.f32.mrb[19].mxu0  ;;  %v2305_v46 = vsel %vm365_vm2, %v4191_v44, -inf }
 0x84f   :  { %2306 = vmax.xlane.f32.xlu0 %v2305_v46 }
 0x851   :  { %v4195_v48 = vpop.f32.mrb[20].mxu0 }
 0x852   :  { %v3535_v49 = vpop.f32.mrb[21].mxu0  ;;  %v2475_v50 = vsel %vm365_vm2, %v4195_v48, -inf }
 0x853   :  { %2476 = vmax.xlane.f32.xlu1 %v2475_v50 }
 0x855   :  { %v4199_v51 = vpop.f32.mrb[22].mxu0 }
 0x856   :  { %v3545_v40 = vpop.f32.mrb[23].mxu0  ;;  %v2645_v43 = vsel %vm365_vm2, %v4199_v51, -inf }
 0x857   :  { %2646 = vmax.xlane.f32.xlu0 %v2645_v43 }
 0x859   :  { %v4203_v52 = vpop.f32.mrb[24].mxu0 }
 0x85a   :  { %v3555_v53 = vpop.f32.mrb[25].mxu0  ;;  %v2815_v54 = vsel %vm365_vm2, %v4203_v52, -inf }
 0x85b   :  { %2816 = vmax.xlane.f32.xlu1 %v2815_v54 }
 0x85d   :  { %v4209_v56 = vpop.f32.mrb[26].mxu0 }
 0x85e   :  { %v3565_v57 = vpop.f32.mrb[27].mxu0  ;;  %v2985_v58 = vsel %vm365_vm2, %v4209_v56, -inf }
 0x85f   :  { %2986 = vmax.xlane.f32.xlu0 %v2985_v58  ;;  %1297 = vadd.xlane.f32.xlu1 %v1296_v59 }
 0x863   :  { %1126 = vadd.xlane.f32.xlu0 %v1125_v37 }
 0x8c5   :  { %v1463_v61 = vpop.xlane.xlu1 %1462 }
 0x8c6   :  { %v1464_v62 = vsub.f32 %v1457_v13, %v1463_v61 }
 0x8c8   :  { %v1465_v41 = vmul.f32 1.442695, %v1464_v62 }
 0x8ca   :  { %3692 = vpow2.f32 %v1465_v41 }
 0x8cc   :  { %v1634_v63 = vpop.xlane.xlu0 %1633 }
 0x8cd   :  { %v1635_v0 = vsub.f32 %v1628_v18, %v1634_v63 }
 0x8cf   :  { %v1636_v1 = vmul.f32 1.442695, %v1635_v0 }
 0x8d0   :  { %v1803_v2 = vpop.xlane.xlu1 %1802 }
 0x8d1   :  { %3694 = vpow2.f32 %v1636_v1  ;;  %v1804_v3 = vsub.f32 %v1797_v24, %v1803_v2 }
 0x8d3   :  { %v1805_v4 = vmul.f32 1.442695, %v1804_v3 }
 0x8d4   :  { %v4219_v5 = vpop.eup %3692  ;;  %v1966_v8 = vpop.xlane.xlu0 %1965 }
 0x8d5   :  { %3696 = vpow2.f32 %v1805_v4  ;;  %v1967_v9 = vsub.f32 %v1960_v27, %v1966_v8  ;;  %v1467_v10 = vsel %vm365_vm2, %v4219_v5, 0.0 }
 0x8d6   :  { %1468 = vadd.xlane.f32.xlu0 %v1467_v10 }
 0x8d7   :  { %v1968_v11 = vmul.f32 1.442695, %v1967_v9 }
 0x8d8   :  { %v2137_v12 = vpop.xlane.xlu1 %2136 }
 0x8d9   :  { %3698 = vpow2.f32 %v1968_v11  ;;  %v2138_v13 = vsub.f32 %v2131_v35, %v2137_v12 }
 0x8db   :  { %v4223_v14 = vpop.eup %3694  ;;  %v2139_v15 = vmul.f32 1.442695, %v2138_v13 }
 0x8dc   :  { %v1638_v17 = vsel %vm365_vm2, %v4223_v14, 0.0  ;;  %v2307_v22 = vpop.xlane.xlu0 %2306 }
 0x8dd   :  { %3700 = vpow2.f32 %v2139_v15  ;;  %1639 = vadd.xlane.f32.xlu1 %v1638_v17  ;;  %v2308_v31 = vsub.f32 %v4191_v44, %v2307_v22 }
 0x8df   :  { %v4227_v18 = vpop.eup %3696  ;;  %v2309_v33 = vmul.f32 1.442695, %v2308_v31 }
 0x8e0   :  { %v1807_v19 = vsel %vm365_vm2, %v4227_v18, 0.0  ;;  %v2477_v38 = vpop.xlane.xlu1 %2476 }
 0x8e1   :  { %1808 = vadd.xlane.f32.xlu0 %v1807_v19  ;;  %3702 = vpow2.f32 %v2309_v33  ;;  %v2478_v45 = vsub.f32 %v4195_v48, %v2477_v38 }
 0x8e3   :  { %v4231_v20 = vpop.eup %3698  ;;  %v2479_v46 = vmul.f32 1.442695, %v2478_v45 }
 0x8e4   :  { %v1970_v23 = vsel %vm365_vm2, %v4231_v20, 0.0  ;;  %v2647_v25 = vpop.xlane.xlu0 %2646 }
 0x8e5   :  { %1971 = vadd.xlane.f32.xlu1 %v1970_v23  ;;  %v2648_v47 = vsub.f32 %v4199_v51, %v2647_v25 }
 0x8e7   :  { %v4235_v24 = vpop.eup %3700  ;;  %v2649_v49 = vmul.f32 1.442695, %v2648_v47 }
 0x8e8   :  { %v2141_v26 = vsel %vm365_vm2, %v4235_v24, 0.0  ;;  %v2817_v39 = vpop.xlane.xlu1 %2816 }
 0x8e9   :  { %2142 = vadd.xlane.f32.xlu1 %v2141_v26  ;;  %v2818_v42 = vsub.f32 %v4203_v52, %v2817_v39 }
 0x8eb   :  { %v4245_v34 = vpop.eup %3702  ;;  %v2819_v44 = vmul.f32 1.442695, %v2818_v42 }
 0x8ec   :  { %v2987_v27 = vpop.xlane.xlu0 %2986  ;;  %v2311_v35 = vsel %vm365_vm2, %v4245_v34, 0.0  ;;  %v1298_v58 = vpop.xlane.xlu1 %1297 }
 0x8ed   :  { %v2988_v29 = vsub.f32 %v4209_v56, %v2987_v27  ;;  %3704 = vpow2.f32 %v2819_v44 }
 0x8ee   :  { %3706 = vpow2.f32 %v2479_v46 }
 0x8ef   :  { %3708 = vpow2.f32 %v2649_v49  ;;  %v2989_v3 = vmul.f32 1.442695, %v2988_v29 }
 0x8f0   :  { %v1127_v51 = vpop.xlane.xlu0 %1126 }
 0x8f7   :  { %959 = vrot.lane.b32.xlu0 %v4028_v7, %s3869_s19  ;;  %v4258_v50 = vpop.eup %3704 }
 0x8f8   :  { %v2821_v40 = vsel %vm365_vm2, %v4258_v50, 0.0  ;;  %v4262_v43 = vpop.eup %3706 }
 0x8f9   :  { %v2481_v52 = vsel %vm365_vm2, %v4262_v43, 0.0  ;;  %v4266_v53 = vpop.eup %3708 }
 0x8fa   :  { %1130 = vrot.lane.b32.xlu1 %v4028_v7, %s3870_s20  ;;  %v2651_v48 = vsel %vm365_vm2, %v4266_v53, 0.0 }
 0x916   :  { %2312 = vadd.xlane.f32.xlu0 %v2311_v35 }
 0x91e   :  { %949 = vmax.xlane.f32.xlu1 %v948_v36 }
 0x92c   :  { %1472 = vrot.lane.b32.xlu0 %v4028_v7, %s3873_s24 }
 0x92f   :  { %1301 = vrot.lane.b32.xlu1 %v4028_v7, %s3871_s22 }
 0x94b   :  { %2822 = vadd.xlane.f32.xlu0 %v2821_v40 }
 0x953   :  { %2482 = vadd.xlane.f32.xlu1 %v2481_v52 }
 0x957   :  { %2652 = vadd.xlane.f32.xlu1 %v2651_v48 }
 0x961   :  { %1976 = vrot.lane.b32.xlu0 %v4026_v6, %s3867_s17 }
 0x963   :  { %v1469_v54 = vpop.xlane.xlu0 %1468 }
 0x965   :  { %2316 = vrot.lane.b32.xlu0 %v4026_v6, %s3869_s19 }
 0x969   :  { %2486 = vrot.lane.b32.xlu0 %v4026_v6, %s3870_s20 }
 0x96a   :  { %v1640_v59 = vpop.xlane.xlu1 %1639 }
 0x96d   :  { %2656 = vrot.lane.b32.xlu0 %v4026_v6, %s3871_s22 }
 0x96e   :  { %v1809_v56 = vpop.xlane.xlu0 %1808 }
 0x971   :  { %2996 = vrot.lane.b32.xlu0 %v4026_v6, %s3872_s23 }
 0x972   :  { %v960_v57 = vpop.permute.xlu0 %959  ;;  %v1972_v37 = vpop.xlane.xlu1 %1971 }
 0x973   :  { %3447 = vmatpush3.msra.mxu1 %v960_v57 }
 0x974   :  { %3456 = vmatprep.subr.mxu1 %v3865_v28 }
 0x975   :  { %865 = vrot.lane.b32.xlu0 %v4183_v16, %s3874_s25 }
 0x976   :  { %v4283_v61 = vpop.xlane.xlu1 %2142 }
 0x97a   :  { %v1131_v62 = vpop.permute.xlu1 %1130 }
 0x9a3   :  { %v2313_v13 = vpop.xlane.xlu0 %2312 }
 0x9a7   :  { %v1473_v22 = vpop.permute.xlu0 %1472 }
 0x9ab   :  { %v950_v41 = vpop.xlane.xlu1 %949 }
 0x9ac   :  { %v951_v63 = vsub.f32 %v4186_v21, %v950_v41 }
 0x9ae   :  { %v952_v0 = vmul.f32 1.442695, %v951_v63 }
 0x9af   :  { %v1302_v21 = vpop.permute.xlu1 %1301 }
 0x9b0   :  { %3710 = vpow2.f32 %v952_v0 }
 0x9b1   :  { %3712 = vpow2.f32 %v2989_v3 }
 0x9ba   :  { %v3711_v1 = vpop.eup %3710 }
 0x9bb   :  { %v954_v2 = vsel %vm365_vm2, %v3711_v1, 0.0  ;;  %v4289_v16 = vpop.eup %3712 }
 0x9bc   :  { %955 = vadd.xlane.f32.xlu1 %v954_v2  ;;  %v2991_v4 = vsel %vm365_vm2, %v4289_v16, 0.0  ;;  %v3081_v2 = vld [vmem:[#allocation9 + $0xc8] sm:$0xff] }
 0x9cd   :  { %1643 = vrot.lane.b32.xlu1 %v4028_v7, %s3872_s23 }
 0x9d8   :  { %v2823_v26 = vpop.xlane.xlu0 %2822 }
 0x9dc   :  { %v1977_v31 = vpop.permute.xlu0 %1976 }
 0x9e0   :  { %v2483_v8 = vpop.xlane.xlu1 %2482 }
 0x9e4   :  { %v2653_v7 = vpop.xlane.xlu1 %2652 }
 0x9f1   :  { %2992 = vadd.xlane.f32.xlu1 %v2991_v4 }
 0xa02   :  { %2146 = vrot.lane.b32.xlu1 %v4026_v6, %s3868_s18 }
 0xa06   :  { %2826 = vrot.lane.b32.xlu1 %v4026_v6, %s3873_s24 }
 0xa0a   :  { %694 = vrot.lane.b32.xlu1 %v4071_v32, %s3862_s6 }
 0xa49   :  { %v956_v9 = vpop.xlane.xlu1 %955 }
 0xa4a   :  { %3714 = vrcp.f32 %v956_v9 }
 0xa4b   :  { %3716 = vrcp.f32 %v1127_v51 }
 0xa4c   :  { %3718 = vrcp.f32 %v1298_v58 }
 0xa4d   :  { %3720 = vrcp.f32 %v1469_v54  ;;  %v1644_v25 = vpop.permute.xlu1 %1643 }
 0xa4e   :  { %3722 = vrcp.f32 %v1640_v59 }
 0xa4f   :  { %3724 = vrcp.f32 %v1809_v56 }
 0xa50   :  { %3726 = vrcp.f32 %v1972_v37 }
 0xa51   :  { %3728 = vrcp.f32 %v4283_v61 }
 0xa52   :  { %3730 = vrcp.f32 %v2313_v13 }
 0xa53   :  { %3732 = vrcp.f32 %v2483_v8  ;;  %v3083_v8 = vld [vmem:[#allocation9 + $0xd8] sm:$0xff] }
 0xa54   :  { %v3715_v10 = vpop.eup %3714  ;;  %3734 = vrcp.f32 %v2653_v7 }
 0xa55   :  { %v958_v11 = vmul.f32 %v3715_v10, %v3711_v1  ;;  %v3717_v12 = vpop.eup %3716  ;;  %3736 = vrcp.f32 %v2823_v26  ;;  %v3080_v1 = vld [vmem:[#allocation9 + $0xc0] sm:$0xff] }
 0xa56   :  { %v1129_v32 = vmul.f32 %v3717_v12, %v4215_v60  ;;  %v3719_v15 = vpop.eup %3718  ;;  %v3638_v3 = vpack.c.bf16 %v3081_v2, %v3080_v1  ;;  %v3085_v12 = vld [vmem:[#allocation9 + $0xe8] sm:$0xff] }
 0xa57   :  { %3449 = vmatmul.mubr.msk.f32.vlgmr.msra.gmra.mrb[16].mxu1 %vm365_vm2, %v958_v11  ;;  %v1300_v17 = vmul.f32 %v3719_v15, %v4207_v55  ;;  %v3721_v19 = vpop.eup %3720  ;;  %v3084_v11 = vld [vmem:[#allocation9 + $0xe0] sm:$0xff]  ;;  %v3086_v15 = vld [vmem:[#allocation9 + $0xf0] sm:$0xff] }
 0xa58   :  { %3457 = vmatpush3.msra.mxu1 %v1131_v62  ;;  %3458 = vmatprep.mubr.msk.f32.mxu1 %vm3866_vm1, %v3865_v28  ;;  %v1471_v60 = vmul.f32 %v3721_v19, %v4219_v5  ;;  %v3723_v23 = vpop.eup %3722 }
 0xa59   :  { %3466 = vmatprep.subr.mxu1 %v3865_v28  ;;  %v1642_v55 = vmul.f32 %v3723_v23, %v4223_v14  ;;  %v3725_v27 = vpop.eup %3724  ;;  %3639 = vmatprep.subr.bf16.mxu0 %v3638_v3 }
 0xa5a   :  { %v1811_v5 = vmul.f32 %v3725_v27, %v4227_v18  ;;  %v3727_v29 = vpop.eup %3726  ;;  %3641 = vmatpush3.bf16.msra.mxu0 %v3638_v3 }
 0xa5b   :  { %3459 = vmatmul.mubr.msk.f32.vlgmr.msra.gmra.mrb[18].mxu1 %vm365_vm2, %v1129_v32  ;;  %v1974_v14 = vmul.f32 %v3727_v29, %v4231_v20  ;;  %v3729_v35 = vpop.eup %3728  ;;  %v3646_v32 = vpack.c.bf16 %v3085_v12, %v3084_v11 }
 0xa5c   :  { %3467 = vmatpush3.msra.mxu1 %v1302_v21  ;;  %3468 = vmatprep.mubr.msk.f32.mxu1 %vm3866_vm1, %v3865_v28  ;;  %v2145_v38 = vmul.f32 %v3729_v35, %v4235_v24  ;;  %v3731_v39 = vpop.eup %3730  ;;  %v3082_v21 = vld [vmem:[#allocation9 + $0xd0] sm:$0xff] }
 0xa5d   :  { %3476 = vmatprep.subr.mxu1 %v3865_v28  ;;  %v2315_v44 = vmul.f32 %v3731_v39, %v4245_v34  ;;  %v3733_v46 = vpop.eup %3732  ;;  %v3642_v7 = vpack.c.bf16 %v3083_v8, %v3082_v21 }
 0xa5e   :  { %v2485_v24 = vmul.f32 %v3733_v46, %v4262_v43  ;;  %v3735_v49 = vpop.eup %3734  ;;  %v3740_v46 = vld [vmem:[%s4415_s4] sm:$0xf] }
 0xa5f   :  { %3469 = vmatmul.mubr.msk.f32.vlgmr.msra.gmra.mrb[20].mxu1 %vm365_vm2, %v1300_v17  ;;  %v2655_v40 = vmul.f32 %v3735_v49, %v4266_v53  ;;  %v3737_v43 = vpop.eup %3736  ;;  %3643 = vmatprep.subr.bf16.mxu0 %v3642_v7  ;;  %v3087_v17 = vld [vmem:[#allocation9 + $0xf8] sm:$0xff] }
 0xa60   :  { %3477 = vmatpush3.msra.mxu1 %v1473_v22  ;;  %3478 = vmatprep.mubr.msk.f32.mxu1 %vm3866_vm1, %v3865_v28  ;;  %v2825_v52 = vmul.f32 %v3737_v43, %v4258_v50  ;;  %v3650_v22 = vpack.c.bf16 %v3087_v17, %v3086_v15 }
 0xa61   :  { %3486 = vmatprep.subr.mxu1 %v3865_v28  ;;  %3645 = vmatpush3.bf16.msra.mxu0 %v3642_v7 }
 0xa62   :  { %3647 = vmatprep.subr.bf16.mxu0 %v3646_v32 }
 0xa63   :  { %3479 = vmatmul.mubr.msk.f32.vlgmr.msra.gmra.mrb[22].mxu1 %vm365_vm2, %v1471_v60 }
 0xa64   :  { %3487 = vmatpush3.msra.mxu1 %v1644_v25  ;;  %3488 = vmatprep.mubr.msk.f32.mxu1 %vm3866_vm1, %v3865_v28 }
 0xa65   :  { %3496 = vmatprep.subr.mxu1 %v3865_v28  ;;  %3649 = vmatpush3.bf16.msra.mxu0 %v3646_v32 }
 0xa66   :  { %3651 = vmatprep.subr.bf16.mxu0 %v3650_v22 }
 0xa67   :  { %3489 = vmatmul.mubr.msk.f32.vlgmr.msra.gmra.mrb[24].mxu1 %vm365_vm2, %v1642_v55 }
 0xa68   :  { %3497 = vmatpush3.msra.mxu1 %v4026_v6  ;;  %3498 = vmatprep.mubr.msk.f32.mxu1 %vm3866_vm1, %v3865_v28  ;;  %v2317_v6 = vpop.permute.xlu0 %2316 }
 0xa69   :  { %3506 = vmatprep.subr.mxu1 %v3865_v28  ;;  %3653 = vmatpush3.bf16.msra.mxu0 %v3650_v22 }
 0xa6b   :  { %3499 = vmatmul.mubr.msk.f32.vlgmr.msra.gmra.mrb[26].mxu1 %vm365_vm2, %v1811_v5 }
 0xa6c   :  { %3507 = vmatpush3.msra.mxu1 %v1977_v31  ;;  %3508 = vmatprep.mubr.msk.f32.mxu1 %vm3866_vm1, %v3865_v28  ;;  %v2487_v18 = vpop.permute.xlu0 %2486 }
 0xa6d   :  { %3516 = vmatprep.subr.mxu1 %v3865_v28 }
 0xa6f   :  { %3509 = vmatmul.mubr.msk.f32.vlgmr.msra.gmra.mrb[28].mxu1 %vm365_vm2, %v1974_v14 }
 0xa70   :  { %3518 = vmatprep.mubr.msk.f32.mxu1 %vm3866_vm1, %v3865_v28  ;;  %v2657_v36 = vpop.permute.xlu0 %2656 }
 0xa74   :  { %v2997_v42 = vpop.permute.xlu0 %2996 }
 0xa78   :  { %v866_v34 = vpop.permute.xlu0 %865 }
 0xa7e   :  { %v2993_v33 = vpop.xlane.xlu1 %2992 }
 0xa7f   :  { %3738 = vrcp.f32 %v2993_v33 }
 0xa82   :  { %v2147_v20 = vpop.permute.xlu1 %2146 }
 0xa83   :  { %3517 = vmatpush3.msra.mxu1 %v2147_v20 }
 0xa84   :  { %3519 = vmatmul.mubr.msk.f32.vlgmr.msra.gmra.mrb[30].mxu1 %vm365_vm2, %v2145_v38  ;;  %3526 = vmatprep.subr.mxu1 %v3865_v28 }
 0xa85   :  { %3527 = vmatpush3.msra.mxu1 %v2317_v6  ;;  %3528 = vmatprep.mubr.msk.f32.mxu1 %vm3866_vm1, %v3865_v28 }
 0xa86   :  { %v2827_v45 = vpop.permute.xlu1 %2826  ;;  %3536 = vmatprep.subr.mxu1 %v3865_v28 }
 0xa88   :  { %3529 = vmatmul.mubr.msk.f32.vlgmr.msra.gmra.mrb[32].mxu1 %vm365_vm2, %v2315_v44 }
 0xa89   :  { %3537 = vmatpush3.msra.mxu1 %v2487_v18  ;;  %3538 = vmatprep.mubr.msk.f32.mxu1 %vm3866_vm1, %v3865_v28  ;;  %v3739_v48 = vpop.eup %3738 }
 0xa8a   :  { %v695_v47 = vpop.permute.xlu1 %694  ;;  %3546 = vmatprep.subr.mxu1 %v3865_v28  ;;  %v2995_v53 = vmul.f32 %v3739_v48, %v4289_v16 }
 0xa8b   :  { %698 = vst.msk [vmem:[#allocation2] sm:$0xff] %vm697_vm3, %v695_v47 }
 0xa8c   :  { %3539 = vmatmul.mubr.msk.f32.vlgmr.msra.gmra.mrb[34].mxu1 %vm365_vm2, %v2485_v24  ;;  %869 = vst.msk [vmem:[#allocation2] sm:$0xff] %vm868_vm4, %v866_v34 }
 0xa8d   :  { %3547 = vmatpush3.msra.mxu1 %v2657_v36  ;;  %3548 = vmatprep.mubr.msk.f32.mxu1 %vm3866_vm1, %v3865_v28 }
 0xa8e   :  { %3556 = vmatprep.subr.mxu1 %v3865_v28 }
 0xa90   :  { %3549 = vmatmul.mubr.msk.f32.vlgmr.msra.gmra.mrb[36].mxu1 %vm365_vm2, %v2655_v40 }
 0xa91   :  { %3557 = vmatpush3.msra.mxu1 %v2827_v45  ;;  %3558 = vmatprep.mubr.msk.f32.mxu1 %vm3866_vm1, %v3865_v28  ;;  %v3090_v45 = vsub.s32 3, %v3992_v30 }
 0xa92   :  { %3566 = vmatprep.subr.mxu1 %v3865_v28 }
 0xa93   :  { %v3091_v24 = vrot.slane %v3740_v46, %v3090_v45 }
 0xa94   :  { %3559 = vmatmul.mubr.msk.f32.vlgmr.msra.gmra.mrb[38].mxu1 %vm365_vm2, %v2825_v52 }
 0xa95   :  { %3567 = vmatpush3.msra.mxu1 %v2997_v42  ;;  %3568 = vmatprep.mubr.msk.f32.mxu1 %vm3866_vm1, %v3865_v28 }
 0xa98   :  { %3569 = vmatmul.mubr.msk.f32.vlgmr.msra.gmra.mrb[40].mxu1 %vm365_vm2, %v2995_v53 }
 0xb2a   :  { %v1031_v51 = vpop.f32.mrb[16].mxu1 }
 0xb2b   :  { %1036 = vrot.lane.b32.xlu0 %v1031_v51, %s3875_s26  ;;  %v3450_v54 = vpop.f32.mrb[17].mxu1 }
 0xb2e   :  { %v1202_v56 = vpop.f32.mrb[18].mxu1 }
 0xb2f   :  { %1207 = vrot.lane.b32.xlu0 %v1202_v56, %s3876_s27  ;;  %v3460_v50 = vpop.f32.mrb[19].mxu1 }
 0xb32   :  { %v1373_v57 = vpop.f32.mrb[20].mxu1 }
 0xb33   :  { %1378 = vrot.lane.b32.xlu0 %v1373_v57, %s3877_s28  ;;  %v3470_v58 = vpop.f32.mrb[21].mxu1 }
 0xb36   :  { %v1544_v28 = vpop.f32.mrb[22].mxu1 }
 0xb37   :  { %1549 = vrot.lane.b32.xlu0 %v1544_v28, %s3878_s29  ;;  %v3480_v59 = vpop.f32.mrb[23].mxu1 }
 0xb3a   :  { %v1715_v37 = vpop.f32.mrb[24].mxu1 }
 0xb3b   :  { %1720 = vrot.lane.b32.xlu0 %v1715_v37, %s3879_s0  ;;  %v3490_v61 = vpop.f32.mrb[25].mxu1 }
 0xb3e   :  { %v1881_v62 = vpop.f32.mrb[26].mxu1 }
 0xb3f   :  { %1885 = vst.msk [vmem:[#allocation2 + $0x8] sm:$0xff] %vm365_vm2, %v1881_v62  ;;  %v3500_v41 = vpop.f32.mrb[27].mxu1 }
 0xb42   :  { %v2048_v63 = vpop.f32.mrb[28].mxu1 }
 0xb43   :  { %2053 = vrot.lane.b32.xlu1 %v2048_v63, %s3862_s6  ;;  %v3510_v0 = vpop.f32.mrb[29].mxu1 }
 0xb57   :  { %v2218_v16 = vpop.f32.mrb[30].mxu1 }
 0xb58   :  { %2223 = vrot.lane.b32.xlu1 %v2218_v16, %s3874_s25  ;;  %v3520_v4 = vpop.f32.mrb[31].mxu1 }
 0xb5b   :  { %v2388_v9 = vpop.f32.mrb[32].mxu1 }
 0xb5c   :  { %2393 = vrot.lane.b32.xlu1 %v2388_v9, %s3875_s26  ;;  %v3530_v10 = vpop.f32.mrb[33].mxu1 }
 0xb5f   :  { %v2558_v13 = vpop.f32.mrb[34].mxu1 }
 0xb60   :  { %2563 = vrot.lane.b32.xlu1 %v2558_v13, %s3876_s27  ;;  %v3540_v19 = vpop.f32.mrb[35].mxu1 }
 0xb63   :  { %v2728_v60 = vpop.f32.mrb[36].mxu1 }
 0xb64   :  { %2733 = vrot.lane.b32.xlu1 %v2728_v60, %s3877_s28  ;;  %v3550_v23 = vpop.f32.mrb[37].mxu1 }
 0xb67   :  { %v2898_v25 = vpop.f32.mrb[38].mxu1 }
 0xb68   :  { %2903 = vrot.lane.b32.xlu1 %v2898_v25, %s3878_s29  ;;  %v3560_v55 = vpop.f32.mrb[39].mxu1 }
 0xb6b   :  { %v3068_v26 = vpop.f32.mrb[40].mxu1 }
 0xb6c   :  { %3073 = vrot.lane.b32.xlu0 %v3068_v26, %s3879_s0  ;;  %v3570_v27 = vpop.f32.mrb[41].mxu1 }
 0xb9d   :  { %v1037_v5 = vpop.permute.xlu0 %1036 }
 0xb9e   :  { %1040 = vst.msk [vmem:[#allocation2] sm:$0xff] %vm1039_vm5, %v1037_v5 }
 0xba1   :  { %v1208_v29 = vpop.permute.xlu0 %1207 }
 0xba2   :  { %1211 = vst.msk [vmem:[#allocation2] sm:$0xff] %vm1210_vm6, %v1208_v29 }
 0xba5   :  { %v1379_v31 = vpop.permute.xlu0 %1378 }
 0xba6   :  { %1382 = vst.msk [vmem:[#allocation2] sm:$0xff] %vm1381_vm7, %v1379_v31 }
 0xba9   :  { %v1550_v14 = vpop.permute.xlu0 %1549 }
 0xbaa   :  { %1553 = vst.msk [vmem:[#allocation2] sm:$0xff] %vm1552_vm8, %v1550_v14 }
 0xbad   :  { %v1721_v6 = vpop.permute.xlu0 %1720 }
 0xbae   :  { %1724 = vst.msk [vmem:[#allocation2] sm:$0xff] %vm1723_vm9, %v1721_v6 }
 0xbb5   :  { %v2054_v18 = vpop.permute.xlu1 %2053  ;;  %v3077_v33 = vld [vmem:[#allocation2] sm:$0xff] }
 0xbb6   :  { %2056 = vst.msk [vmem:[#allocation2 + $0x8] sm:$0xff] %vm697_vm3, %v2054_v18  ;;  %3587 = vmatprep.mubr.msk.f32.mxu0 %vm95_vm0, %v3077_v33 }
 0xbca   :  { %v2224_v35 = vpop.permute.xlu1 %2223 }
 0xbcb   :  { %2226 = vst.msk [vmem:[#allocation2 + $0x8] sm:$0xff] %vm868_vm4, %v2224_v35 }
 0xbce   :  { %v2394_v36 = vpop.permute.xlu1 %2393 }
 0xbcf   :  { %2396 = vst.msk [vmem:[#allocation2 + $0x8] sm:$0xff] %vm1039_vm5, %v2394_v36 }
 0xbd2   :  { %v2564_v38 = vpop.permute.xlu1 %2563 }
 0xbd3   :  { %2566 = vst.msk [vmem:[#allocation2 + $0x8] sm:$0xff] %vm1210_vm6, %v2564_v38 }
 0xbd6   :  { %v2734_v20 = vpop.permute.xlu1 %2733 }
 0xbd7   :  { %2736 = vst.msk [vmem:[#allocation2 + $0x8] sm:$0xff] %vm1381_vm7, %v2734_v20 }
 0xbda   :  { %v2904_v39 = vpop.permute.xlu1 %2903 }
 0xbdb   :  { %2906 = vst.msk [vmem:[#allocation2 + $0x8] sm:$0xff] %vm1552_vm8, %v2904_v39 }
 0xbde   :  { %v3074_v42 = vpop.permute.xlu0 %3073 }
 0xbdf   :  { %3076 = vst.msk [vmem:[#allocation2 + $0x8] sm:$0xff] %vm1723_vm9, %v3074_v42 }
 0xbe6   :  { %v3078_v44 = vld [vmem:[#allocation2 + $0x8] sm:$0xff] }
 0xbe7   :  { %3588 = vmatmul.mubr.msk.f32.vlgmr.msra.gmra.mrb[28].mxu0 %vm95_vm0, %v3078_v44 }
 0xcba   :  { %v3589_v47 = vpop.f32.mrb[28].mxu0 }
 0xcbb   :  { %v3170_v49 = vadd.f32 %v3589_v47, %v3091_v24  ;;  %v3164_v34 = vpop.f32.mrb[29].mxu0 }
 0xcbc   :  { %v3165_v40 = vadd.f32 %v3164_v34, %v3091_v24 }
 0xcbd   :  { %3174 = vst.msk [vmem:[#allocation11 + $0x8] sm:$0xff] %vm95_vm0, %v3170_v49 }
 0xcbe   :  { %3173 = vst.msk [vmem:[#allocation11] sm:$0xff] %vm95_vm0, %v3165_v40 }
 0xcbf   :  { %3840 = shalt.err (!%p3837_p8)
}
 0xcc0   :  { %s3841_s12 = scalar_lea.hbm %s4416_s5, 256 }
 0xcc1   :  { %p3842_p9 = scmp.ne.s32.totalorder %s4416_s5, %s3841_s12  ;;  %p3845_p10 = scmp.lt.u32.totalorder %s3841_s12, %s4416_s5 }
 0xcc3   :  { %p3847_p11 = pnand %p3845_p10, %p3842_p9 }
 0xcc5   :  { %3850 = shalt.err (!%p3847_p11)
}
 0xcc6   :  { %3186 = dma.vmem_to_hbm [thread:$0]  %s3181_s9, 256, %s4416_s5, [#allocation5], %s3861_s30, %s3861_s30, %s3862_s6  }
 0xcc7   :  { %3857 = dma.done.wait [#allocation5], 256  }
 0xcc8   :  { %3858 = vsyncadd [#allocation5], 4294967040 }
 0xcc9   :  { %3190 = vsyncpa [#allocation4], 1 }
 0xcca   :  { %3191 = vsyncpa [#allocation7], 1 }
 0xccb   :  { %3192 = vsyncpa [#allocation10], 1 }
 0xccc   :  { %3193 = vsyncpa [#allocation5], 1 }

</bundles_post_ra>
